<compile_context>
chip_gen: v5e
topology: v5e:2x2
jax: 0.10.0
libtpu: 0.0.40
codegen_flags: <defaults>
</compile_context>

<pallas_src>
import functools

import jax
import jax.numpy as jnp
from jax import lax
from jax.experimental import pallas as pl
from jax.experimental.pallas import tpu as pltpu

EPS = 1e-5
LANE = 128                       # pad channel dims to multiples of the lane width
MATMUL_DTYPE = jnp.bfloat16      # MXU input dtype (f32 accumulation everywhere)
VMEM_LIMIT = 48 * 1024 * 1024    # headroom under v7x's 64 MiB physical VMEM


def _round_up(x, m):
    return ((x + m - 1) // m) * m


def _compiler_params():
    return pltpu.CompilerParams(
        dimension_semantics=("parallel",),       # grid steps are independent (megacore on v7x)
        vmem_limit_bytes=VMEM_LIMIT,
    )


# ----------------------------- in-kernel helpers ---------------------------- #

def _valid_col_mask(Mq, Wp, W2):
    # Row-flattened layout stores Wp = W2 + 2 columns per image row; the last two
    # ("junk") columns are only there so every conv tap is a contiguous slice.
    col = lax.broadcasted_iota(jnp.int32, (Mq, 1), 0) % Wp
    return col < W2


def _partial_stats(y):
    # Per-grid-step BatchNorm partials: [sum ; sum_sq] over rows (junk already zeroed).
    s = jnp.sum(y, axis=0, keepdims=True)
    ss = jnp.sum(y * y, axis=0, keepdims=True)
    return jnp.concatenate([s, ss], axis=0)      # (2, C)


def _accumulate_9taps(pbuf, w_ref, acc_ref, Mq, Wp):
    """3x3 conv as shift-and-matmul: acc += Ppad[q + dy*Wp + dx, :] @ W[dy*3+dx]."""
    acc_ref[...] = jnp.zeros_like(acc_ref)
    for dy in range(3):
        for dx in range(3):
            tap = pbuf[pl.ds(dy * Wp + dx, Mq), :].astype(w_ref.dtype)
            acc_ref[...] += jnp.dot(tap, w_ref[dy * 3 + dx],
                                    preferred_element_type=jnp.float32)


# ------------------------------ Pallas kernels ------------------------------ #

def _pool_conv_kernel(x_ref, w_ref, y_ref, st_ref, pbuf, acc, *, H2, W2, Cin_p):
    """Fused 2x2 max-pool + 3x3 conv (9 shifted MXU matmuls) + BN partial stats.

    x_ref : (H2, 2, W2, 2*Cin_p)   one image; pool taps exposed by a free reshape
    w_ref : (9, Cin_p, Cout_p)     resident conv weights (tap-major), bf16
    y_ref : (1, H2*Wp, Cout_p)     raw (pre-BN) conv output, width-padded row layout, f32
    st_ref: (1, 2, Cout_p)         per-step [sum ; sum_sq] over valid positions
    pbuf  : (PROWS, Cin_p) f32     zero-padded, row-flattened pooled input
    acc   : (H2*Wp, Cout_p) f32    accumulator
    """
    Wp = W2 + 2
    Mq = H2 * Wp

    # ---- fused 2x2 max pool (the two pool rows are a dim, the two cols are lane halves) ----
    x = x_ref[...]                                            # (H2, 2, W2, 2*Cin_p)
    a = jnp.maximum(x[:, 0], x[:, 1])                         # (H2, W2, 2*Cin_p)
    pooled = jnp.maximum(a[..., :Cin_p], a[..., Cin_p:])      # (H2, W2, Cin_p)
    pooled = pooled.astype(jnp.float32)

    # ---- scatter pooled rows into the zero-padded, row-flattened buffer ----
    pbuf[...] = jnp.zeros_like(pbuf)
    for h in range(H2):                                       # static slab stores
        pbuf[pl.ds((h + 1) * Wp + 1, W2), :] = pooled[h]

    # ---- conv + masked output + BN partials ----
    _accumulate_9taps(pbuf, w_ref, acc, Mq, Wp)
    mask = _valid_col_mask(Mq, Wp, W2)
    y = jnp.where(mask, acc[...], 0.0)
    y_ref[0] = y
    st_ref[0] = _partial_stats(y)


def _conv_kernel(y_in_ref, aff_ref, w_ref, y_ref, st_ref, pbuf, acc, *, H2, W2):
    """Fused (BN affine + ReLU of previous conv, on read) + 3x3 conv + BN partial stats.

    y_in_ref: (1, H2*Wp, Cin_p) raw previous conv output (junk columns are zero)
    aff_ref : (2, Cin_p)        row0 = scale = g*rsqrt(var+eps), row1 = shift
    """
    Wp = W2 + 2
    Mq = H2 * Wp
    mask = _valid_col_mask(Mq, Wp, W2)

    h = jnp.maximum(y_in_ref[0] * aff_ref[0:1, :] + aff_ref[1:2, :], 0.0)
    h = jnp.where(mask, h, 0.0)        # junk cols must stay zero: they double as conv padding

    # One shifted contiguous copy yields the zero-padded, row-flattened layout.
    pbuf[...] = jnp.zeros_like(pbuf)
    pbuf[pl.ds(Wp + 1, Mq), :] = h

    _accumulate_9taps(pbuf, w_ref, acc, Mq, Wp)
    y = jnp.where(mask, acc[...], 0.0)
    y_ref[0] = y
    st_ref[0] = _partial_stats(y)


def _affine_relu_kernel(y_ref, aff_ref, o_ref):
    """Finalize: y * scale + shift -> ReLU (single FMA pass, lane-dense stores)."""
    o_ref[0] = jnp.maximum(y_ref[0] * aff_ref[0:1, :] + aff_ref[1:2, :], 0.0)


# ------------------------------ pallas_call wrappers ------------------------ #

def _pool_conv_call(x6, w, N, H2, W2, cin_p, cout_p):
    Wp = W2 + 2
    Mq = H2 * Wp
    prows = (H2 + 2) * Wp + 8        # slack rows so all 9 shifted reads stay in bounds
    kernel = functools.partial(_pool_conv_kernel, H2=H2, W2=W2, Cin_p=cin_p)
    return pl.pallas_call(
        kernel,
        out_shape=(jax.ShapeDtypeStruct((N, Mq, cout_p), jnp.float32),
                   jax.ShapeDtypeStruct((N, 2, cout_p), jnp.float32)),
        grid=(N,),
        in_specs=[
            pl.BlockSpec((H2, 2, W2, 2 * cin_p), lambda n: (n, 0, 0, 0)),
            pl.BlockSpec((9, cin_p, cout_p), lambda n: (0, 0, 0)),      # resident weights
        ],
        out_specs=(
            pl.BlockSpec((1, Mq, cout_p), lambda n: (n, 0, 0)),
            pl.BlockSpec((1, 2, cout_p), lambda n: (n, 0, 0)),
        ),
        scratch_shapes=[
            pltpu.VMEM((prows, cin_p), jnp.float32),
            pltpu.VMEM((Mq, cout_p), jnp.float32),
        ],
        compiler_params=_compiler_params(),
    )(x6, w)


def _conv_call(y_in, aff, w, N, H2, W2, cin_p, cout_p):
    Wp = W2 + 2
    Mq = H2 * Wp
    prows = (H2 + 2) * Wp + 8
    kernel = functools.partial(_conv_kernel, H2=H2, W2=W2)
    return pl.pallas_call(
        kernel,
        out_shape=(jax.ShapeDtypeStruct((N, Mq, cout_p), jnp.float32),
                   jax.ShapeDtypeStruct((N, 2, cout_p), jnp.float32)),
        grid=(N,),
        in_specs=[
            pl.BlockSpec((1, Mq, cin_p), lambda n: (n, 0, 0)),
            pl.BlockSpec((2, cin_p), lambda n: (0, 0)),
            pl.BlockSpec((9, cin_p, cout_p), lambda n: (0, 0, 0)),
        ],
        out_specs=(
            pl.BlockSpec((1, Mq, cout_p), lambda n: (n, 0, 0)),
            pl.BlockSpec((1, 2, cout_p), lambda n: (n, 0, 0)),
        ),
        scratch_shapes=[
            pltpu.VMEM((prows, cin_p), jnp.float32),
            pltpu.VMEM((Mq, cout_p), jnp.float32),
        ],
        compiler_params=_compiler_params(),
    )(y_in, aff, w)


def _affine_relu_call(y, aff, N, Mq, c_p):
    return pl.pallas_call(
        _affine_relu_kernel,
        out_shape=jax.ShapeDtypeStruct((N, Mq, c_p), jnp.float32),
        grid=(N,),
        in_specs=[
            pl.BlockSpec((1, Mq, c_p), lambda n: (n, 0, 0)),
            pl.BlockSpec((2, c_p), lambda n: (0, 0)),
        ],
        out_specs=pl.BlockSpec((1, Mq, c_p), lambda n: (n, 0, 0)),
        compiler_params=_compiler_params(),
    )(y, aff)


# ----------------------------------- glue ----------------------------------- #

def _prep_weight(w_oihw, cin_p, cout_p, dtype):
    """PyTorch OIHW -> (9, Cin_p, Cout_p) tap-major matmul weights (zero padded)."""
    cout, cin = w_oihw.shape[0], w_oihw.shape[1]
    w = jnp.transpose(w_oihw, (2, 3, 1, 0)).reshape(9, cin, cout)
    w = jnp.pad(w, ((0, 0), (0, cin_p - cin), (0, cout_p - cout)))
    return w.astype(dtype)


def _bn_scale_shift(stats, gamma, beta, count, c_p):
    """Tiny cross-step BN finalize (O(N*C) work): per-channel scale/shift in f32."""
    s = jnp.sum(stats[:, 0, :], axis=0)
    ss = jnp.sum(stats[:, 1, :], axis=0)
    mean = s / count
    var = jnp.maximum(ss / count - mean * mean, 0.0)   # biased (training-mode) variance
    g = jnp.pad(gamma.astype(jnp.float32), (0, c_p - gamma.shape[0]))
    b = jnp.pad(beta.astype(jnp.float32), (0, c_p - beta.shape[0]))
    scale = g * lax.rsqrt(var + EPS)
    shift = b - mean * scale
    return jnp.stack([scale, shift], axis=0)           # (2, c_p)


def down_forward(x_nchw, params, matmul_dtype=MATMUL_DTYPE):
    """Down: MaxPool2d(2) -> (Conv3x3 -> BN -> ReLU) x 2.  NCHW in, NCHW out."""
    N, Cin, H, W = x_nchw.shape
    assert H % 2 == 0 and W % 2 == 0
    H2, W2 = H // 2, W // 2
    Wp, Mq = W2 + 2, H2 * (W2 + 2)
    Cmid, Cout = params["w1"].shape[0], params["w2"].shape[0]
    cin_p = _round_up(Cin, LANE)
    cmid_p = _round_up(Cmid, LANE)
    cout_p = _round_up(Cout, LANE)
    count = N * H2 * W2                                # BN element count per channel

    # glue: NCHW -> NHWC, lane-pad channels, cast; free reshape exposing the 2x2 pool taps.
    x = jnp.transpose(x_nchw, (0, 2, 3, 1)).astype(matmul_dtype)
    x = jnp.pad(x, ((0, 0), (0, 0), (0, 0), (0, cin_p - Cin)))
    x6 = x.reshape(N * H2, 2, W2, 2 * cin_p)

    w1 = _prep_weight(params["w1"], cin_p, cmid_p, matmul_dtype)
    w2 = _prep_weight(params["w2"], cmid_p, cout_p, matmul_dtype)

    # stage 1: fused maxpool + conv1 + BN1 partial stats
    y1, st1 = _pool_conv_call(x6, w1, N, H2, W2, cin_p, cmid_p)
    aff1 = _bn_scale_shift(st1, params["g1"], params["b1"], count, cmid_p)

    # stage 2: (BN1 + ReLU fused on read) + conv2 + BN2 partial stats
    y2, st2 = _conv_call(y1, aff1, w2, N, H2, W2, cmid_p, cout_p)
    aff2 = _bn_scale_shift(st2, params["g2"], params["b2"], count, cout_p)

    # stage 3: BN2 + ReLU finalize
    out = _affine_relu_call(y2, aff2, N, Mq, cout_p)

    # glue: drop width/channel padding, back to NCHW
    out = out.reshape(N, H2, Wp, cout_p)[:, :, :W2, :Cout]
    return jnp.transpose(out, (0, 3, 1, 2))


# --------------------------- pure-JAX reference ------------------------------ #

def _ref_forward(x_nchw, params, matmul_dtype=MATMUL_DTYPE):
    x = jnp.transpose(x_nchw, (0, 2, 3, 1))
    p = lax.reduce_window(x, -jnp.inf, lax.max, (1, 2, 2, 1), (1, 2, 2, 1), "VALID")
    prec = lax.Precision.HIGHEST if matmul_dtype == jnp.float32 else None

    def block(h, w_pt, g, b):
        w = jnp.transpose(w_pt, (2, 3, 1, 0)).astype(matmul_dtype)      # HWIO
        y = lax.conv_general_dilated(
            h.astype(matmul_dtype), w, (1, 1), "SAME",
            dimension_numbers=("NHWC", "HWIO", "NHWC"),
            preferred_element_type=jnp.float32, precision=prec)
        mean = jnp.mean(y, axis=(0, 1, 2), keepdims=True)
        var = jnp.mean((y - mean) ** 2, axis=(0, 1, 2), keepdims=True)
        return jnp.maximum((y - mean) * lax.rsqrt(var + EPS) * g + b, 0.0)

    h1 = block(p, params["w1"], params["g1"], params["b1"])
    h2 = block(h1, params["w2"], params["g2"], params["b2"])
    return jnp.transpose(h2, (0, 3, 1, 2))


# ---------------------------------- main ------------------------------------ #

if __name__ == "__main__":
    key = jax.random.PRNGKey(0)
    kx, k1, k2 = jax.random.split(key, 3)

    N, Cin, H, W = 2, 4, 16, 16
    Cout = 8
    Cmid = Cout  # DoubleConv default: mid_channels = out_channels

    params = {
        "w1": 0.1 * jax.random.normal(k1, (Cmid, Cin, 3, 3), jnp.float32),   # Conv2d weight OIHW
        "g1": jnp.ones((Cmid,), jnp.float32),    # BN gamma (PyTorch default init)
        "b1": jnp.zeros((Cmid,), jnp.float32),   # BN beta
        "w2": 0.1 * jax.random.normal(k2, (Cout, Cmid, 3, 3), jnp.float32),
        "g2": jnp.ones((Cout,), jnp.float32),
        "b2": jnp.zeros((Cout,), jnp.float32),
    }
    x = jax.random.normal(kx, (N, Cin, H, W), jnp.float32)

    out = jax.block_until_ready(down_forward(x, params))
    assert out.shape == (N, Cout, H // 2, W // 2), out.shape

    # Tight check: reference run with the same MXU input precision (bf16 in, f32 accum).
    ref = jax.block_until_ready(_ref_forward(x, params, MATMUL_DTYPE))
    err = float(jnp.max(jnp.abs(out - ref)))
    assert jnp.allclose(out, ref, atol=2e-3, rtol=2e-3), err

    # Loose sanity check against the exact f32 reference (difference is bf16 MXU inputs).
    ref32 = jax.block_until_ready(_ref_forward(x, params, jnp.float32))
    err32 = float(jnp.max(jnp.abs(out - ref32)))
    assert jnp.allclose(out, ref32, atol=1e-1, rtol=1e-1), err32

    print("KERNEL_OK")
</pallas_src>

<mosaic_0001>
module attributes {stable_mosaic.version = 11 : i64} {
  func.func @_pool_conv_kernel(%arg0: i32, %arg1: memref<8x2x8x256xbf16, #tpu.memory_space<vmem>>, %arg2: memref<9x128x128xbf16, #tpu.memory_space<vmem>>, %arg3: memref<1x80x128xf32, #tpu.memory_space<vmem>>, %arg4: memref<1x2x128xf32, #tpu.memory_space<vmem>>, %arg5: memref<108x128xf32, #tpu.memory_space<vmem>>, %arg6: memref<80x128xf32, #tpu.memory_space<vmem>>) attributes {dimension_semantics = [#tpu.dimension_semantics<parallel>], iteration_bounds = array<i64: 2>, scalar_prefetch = 0 : i64, scratch_operands = 2 : i64, tpu.core_type = #tpu.core_type<tc>, window_params = [{transform_indices = @transform_0, window_bounds = array<i64: 8, 2, 8, 256>}, {pipeline_mode = #tpu.pipeline_mode<synchronous>, transform_indices = @transform_1, window_bounds = array<i64: 9, 128, 128>}, {transform_indices = @transform_2, window_bounds = array<i64: 1, 80, 128>}, {transform_indices = @transform_3, window_bounds = array<i64: 1, 2, 128>}]} {
    %c0 = arith.constant 0 : index
    %c0_0 = arith.constant 0 : index
    %c0_1 = arith.constant 0 : index
    %c0_2 = arith.constant 0 : index
    %0 = vector.load %arg1[%c0, %c0_0, %c0_1, %c0_2] : memref<8x2x8x256xbf16, #tpu.memory_space<vmem>>, vector<8x2x8x256xbf16>
    %1 = vector.extract_strided_slice %0 {offsets = [0, 0, 0, 0], sizes = [8, 1, 8, 256], strides = [1, 1, 1, 1]} : vector<8x2x8x256xbf16> to vector<8x1x8x256xbf16>
    %2 = vector.shape_cast %1 : vector<8x1x8x256xbf16> to vector<8x8x256xbf16>
    %3 = vector.extract_strided_slice %0 {offsets = [0, 1, 0, 0], sizes = [8, 1, 8, 256], strides = [1, 1, 1, 1]} : vector<8x2x8x256xbf16> to vector<8x1x8x256xbf16>
    %4 = vector.shape_cast %3 : vector<8x1x8x256xbf16> to vector<8x8x256xbf16>
    %5 = arith.maximumf %2, %4 : vector<8x8x256xbf16>
    %6 = vector.extract_strided_slice %5 {offsets = [0, 0, 0], sizes = [8, 8, 128], strides = [1, 1, 1]} : vector<8x8x256xbf16> to vector<8x8x128xbf16>
    %7 = vector.extract_strided_slice %5 {offsets = [0, 0, 128], sizes = [8, 8, 128], strides = [1, 1, 1]} : vector<8x8x256xbf16> to vector<8x8x128xbf16>
    %8 = arith.maximumf %6, %7 : vector<8x8x128xbf16>
    %9 = arith.extf %8 : vector<8x8x128xbf16> to vector<8x8x128xf32>
    %cst = arith.constant 0.000000e+00 : f32
    %10 = vector.broadcast %cst : f32 to vector<108x128xf32>
    %c0_3 = arith.constant 0 : index
    %c0_4 = arith.constant 0 : index
    %11 = vector.load %arg5[%c0_3, %c0_4] : memref<108x128xf32, #tpu.memory_space<vmem>>, vector<108x128xf32>
    tpu.vector_store %arg5[%c0_3, %c0_4], %10 {strides = array<i32>} : memref<108x128xf32, #tpu.memory_space<vmem>>, vector<108x128xf32>,
    %12 = vector.extract_strided_slice %9 {offsets = [0, 0, 0], sizes = [1, 8, 128], strides = [1, 1, 1]} : vector<8x8x128xf32> to vector<1x8x128xf32>
    %13 = vector.shape_cast %12 : vector<1x8x128xf32> to vector<8x128xf32>
    %c11 = arith.constant 11 : index
    %c0_5 = arith.constant 0 : index
    %14 = vector.load %arg5[%c11, %c0_5] : memref<108x128xf32, #tpu.memory_space<vmem>>, vector<8x128xf32>
    tpu.vector_store %arg5[%c11, %c0_5], %13 {strides = array<i32>} : memref<108x128xf32, #tpu.memory_space<vmem>>, vector<8x128xf32>,
    %15 = vector.extract_strided_slice %9 {offsets = [1, 0, 0], sizes = [1, 8, 128], strides = [1, 1, 1]} : vector<8x8x128xf32> to vector<1x8x128xf32>
    %16 = vector.shape_cast %15 : vector<1x8x128xf32> to vector<8x128xf32>
    %c21 = arith.constant 21 : index
    %c0_6 = arith.constant 0 : index
    %17 = vector.load %arg5[%c21, %c0_6] : memref<108x128xf32, #tpu.memory_space<vmem>>, vector<8x128xf32>
    tpu.vector_store %arg5[%c21, %c0_6], %16 {strides = array<i32>} : memref<108x128xf32, #tpu.memory_space<vmem>>, vector<8x128xf32>,
    %18 = vector.extract_strided_slice %9 {offsets = [2, 0, 0], sizes = [1, 8, 128], strides = [1, 1, 1]} : vector<8x8x128xf32> to vector<1x8x128xf32>
    %19 = vector.shape_cast %18 : vector<1x8x128xf32> to vector<8x128xf32>
    %c31 = arith.constant 31 : index
    %c0_7 = arith.constant 0 : index
    %20 = vector.load %arg5[%c31, %c0_7] : memref<108x128xf32, #tpu.memory_space<vmem>>, vector<8x128xf32>
    tpu.vector_store %arg5[%c31, %c0_7], %19 {strides = array<i32>} : memref<108x128xf32, #tpu.memory_space<vmem>>, vector<8x128xf32>,
    %21 = vector.extract_strided_slice %9 {offsets = [3, 0, 0], sizes = [1, 8, 128], strides = [1, 1, 1]} : vector<8x8x128xf32> to vector<1x8x128xf32>
    %22 = vector.shape_cast %21 : vector<1x8x128xf32> to vector<8x128xf32>
    %c41 = arith.constant 41 : index
    %c0_8 = arith.constant 0 : index
    %23 = vector.load %arg5[%c41, %c0_8] : memref<108x128xf32, #tpu.memory_space<vmem>>, vector<8x128xf32>
    tpu.vector_store %arg5[%c41, %c0_8], %22 {strides = array<i32>} : memref<108x128xf32, #tpu.memory_space<vmem>>, vector<8x128xf32>,
    %24 = vector.extract_strided_slice %9 {offsets = [4, 0, 0], sizes = [1, 8, 128], strides = [1, 1, 1]} : vector<8x8x128xf32> to vector<1x8x128xf32>
    %25 = vector.shape_cast %24 : vector<1x8x128xf32> to vector<8x128xf32>
    %c51 = arith.constant 51 : index
    %c0_9 = arith.constant 0 : index
    %26 = vector.load %arg5[%c51, %c0_9] : memref<108x128xf32, #tpu.memory_space<vmem>>, vector<8x128xf32>
    tpu.vector_store %arg5[%c51, %c0_9], %25 {strides = array<i32>} : memref<108x128xf32, #tpu.memory_space<vmem>>, vector<8x128xf32>,
    %27 = vector.extract_strided_slice %9 {offsets = [5, 0, 0], sizes = [1, 8, 128], strides = [1, 1, 1]} : vector<8x8x128xf32> to vector<1x8x128xf32>
    %28 = vector.shape_cast %27 : vector<1x8x128xf32> to vector<8x128xf32>
    %c61 = arith.constant 61 : index
    %c0_10 = arith.constant 0 : index
    %29 = vector.load %arg5[%c61, %c0_10] : memref<108x128xf32, #tpu.memory_space<vmem>>, vector<8x128xf32>
    tpu.vector_store %arg5[%c61, %c0_10], %28 {strides = array<i32>} : memref<108x128xf32, #tpu.memory_space<vmem>>, vector<8x128xf32>,
    %30 = vector.extract_strided_slice %9 {offsets = [6, 0, 0], sizes = [1, 8, 128], strides = [1, 1, 1]} : vector<8x8x128xf32> to vector<1x8x128xf32>
    %31 = vector.shape_cast %30 : vector<1x8x128xf32> to vector<8x128xf32>
    %c71 = arith.constant 71 : index
    %c0_11 = arith.constant 0 : index
    %32 = vector.load %arg5[%c71, %c0_11] : memref<108x128xf32, #tpu.memory_space<vmem>>, vector<8x128xf32>
    tpu.vector_store %arg5[%c71, %c0_11], %31 {strides = array<i32>} : memref<108x128xf32, #tpu.memory_space<vmem>>, vector<8x128xf32>,
    %33 = vector.extract_strided_slice %9 {offsets = [7, 0, 0], sizes = [1, 8, 128], strides = [1, 1, 1]} : vector<8x8x128xf32> to vector<1x8x128xf32>
    %34 = vector.shape_cast %33 : vector<1x8x128xf32> to vector<8x128xf32>
    %c81 = arith.constant 81 : index
    %c0_12 = arith.constant 0 : index
    %35 = vector.load %arg5[%c81, %c0_12] : memref<108x128xf32, #tpu.memory_space<vmem>>, vector<8x128xf32>
    tpu.vector_store %arg5[%c81, %c0_12], %34 {strides = array<i32>} : memref<108x128xf32, #tpu.memory_space<vmem>>, vector<8x128xf32>,
    %cst_13 = arith.constant 0.000000e+00 : f32
    %36 = vector.broadcast %cst_13 : f32 to vector<80x128xf32>
    %c0_14 = arith.constant 0 : index
    %c0_15 = arith.constant 0 : index
    %37 = vector.load %arg6[%c0_14, %c0_15] : memref<80x128xf32, #tpu.memory_space<vmem>>, vector<80x128xf32>
    tpu.vector_store %arg6[%c0_14, %c0_15], %36 {strides = array<i32>} : memref<80x128xf32, #tpu.memory_space<vmem>>, vector<80x128xf32>,
    %c0_16 = arith.constant 0 : index
    %c0_17 = arith.constant 0 : index
    %38 = vector.load %arg5[%c0_16, %c0_17] : memref<108x128xf32, #tpu.memory_space<vmem>>, vector<80x128xf32>
    %39 = arith.truncf %38 : vector<80x128xf32> to vector<80x128xbf16>
    %c0_18 = arith.constant 0 : index
    %c0_19 = arith.constant 0 : index
    %40 = vector.load %arg6[%c0_18, %c0_19] : memref<80x128xf32, #tpu.memory_space<vmem>>, vector<80x128xf32>
    %c0_20 = arith.constant 0 : index
    %c0_21 = arith.constant 0 : index
    %c0_22 = arith.constant 0 : index
    %41 = vector.load %arg2[%c0_20, %c0_21, %c0_22] : memref<9x128x128xbf16, #tpu.memory_space<vmem>>, vector<1x128x128xbf16>
    %42 = vector.shape_cast %41 : vector<1x128x128xbf16> to vector<128x128xbf16>
    %cst_23 = arith.constant dense<0.000000e+00> : vector<80x128xf32>
    %43 = tpu.matmul %39, %42, %cst_23 {dimension_numbers = #tpu.dot_dimension_numbers<[1], [0], [0], [1], [0, 0, 1, 1], [], []>} : vector<80x128xbf16>, vector<128x128xbf16>, vector<80x128xf32> -> vector<80x128xf32>
    %44 = arith.addf %40, %43 : vector<80x128xf32>
    %c0_24 = arith.constant 0 : index
    %c0_25 = arith.constant 0 : index
    %45 = vector.load %arg6[%c0_24, %c0_25] : memref<80x128xf32, #tpu.memory_space<vmem>>, vector<80x128xf32>
    tpu.vector_store %arg6[%c0_24, %c0_25], %44 {strides = array<i32>} : memref<80x128xf32, #tpu.memory_space<vmem>>, vector<80x128xf32>,
    %c1 = arith.constant 1 : index
    %c0_26 = arith.constant 0 : index
    %46 = vector.load %arg5[%c1, %c0_26] : memref<108x128xf32, #tpu.memory_space<vmem>>, vector<80x128xf32>
    %47 = arith.truncf %46 : vector<80x128xf32> to vector<80x128xbf16>
    %c0_27 = arith.constant 0 : index
    %c0_28 = arith.constant 0 : index
    %48 = vector.load %arg6[%c0_27, %c0_28] : memref<80x128xf32, #tpu.memory_space<vmem>>, vector<80x128xf32>
    %c1_29 = arith.constant 1 : index
    %c0_30 = arith.constant 0 : index
    %c0_31 = arith.constant 0 : index
    %49 = vector.load %arg2[%c1_29, %c0_30, %c0_31] : memref<9x128x128xbf16, #tpu.memory_space<vmem>>, vector<1x128x128xbf16>
    %50 = vector.shape_cast %49 : vector<1x128x128xbf16> to vector<128x128xbf16>
    %cst_32 = arith.constant dense<0.000000e+00> : vector<80x128xf32>
    %51 = tpu.matmul %47, %50, %cst_32 {dimension_numbers = #tpu.dot_dimension_numbers<[1], [0], [0], [1], [0, 0, 1, 1], [], []>} : vector<80x128xbf16>, vector<128x128xbf16>, vector<80x128xf32> -> vector<80x128xf32>
    %52 = arith.addf %48, %51 : vector<80x128xf32>
    %c0_33 = arith.constant 0 : index
    %c0_34 = arith.constant 0 : index
    %53 = vector.load %arg6[%c0_33, %c0_34] : memref<80x128xf32, #tpu.memory_space<vmem>>, vector<80x128xf32>
    tpu.vector_store %arg6[%c0_33, %c0_34], %52 {strides = array<i32>} : memref<80x128xf32, #tpu.memory_space<vmem>>, vector<80x128xf32>,
    %c2 = arith.constant 2 : index
    %c0_35 = arith.constant 0 : index
    %54 = vector.load %arg5[%c2, %c0_35] : memref<108x128xf32, #tpu.memory_space<vmem>>, vector<80x128xf32>
    %55 = arith.truncf %54 : vector<80x128xf32> to vector<80x128xbf16>
    %c0_36 = arith.constant 0 : index
    %c0_37 = arith.constant 0 : index
    %56 = vector.load %arg6[%c0_36, %c0_37] : memref<80x128xf32, #tpu.memory_space<vmem>>, vector<80x128xf32>
    %c2_38 = arith.constant 2 : index
    %c0_39 = arith.constant 0 : index
    %c0_40 = arith.constant 0 : index
    %57 = vector.load %arg2[%c2_38, %c0_39, %c0_40] : memref<9x128x128xbf16, #tpu.memory_space<vmem>>, vector<1x128x128xbf16>
    %58 = vector.shape_cast %57 : vector<1x128x128xbf16> to vector<128x128xbf16>
    %cst_41 = arith.constant dense<0.000000e+00> : vector<80x128xf32>
    %59 = tpu.matmul %55, %58, %cst_41 {dimension_numbers = #tpu.dot_dimension_numbers<[1], [0], [0], [1], [0, 0, 1, 1], [], []>} : vector<80x128xbf16>, vector<128x128xbf16>, vector<80x128xf32> -> vector<80x128xf32>
    %60 = arith.addf %56, %59 : vector<80x128xf32>
    %c0_42 = arith.constant 0 : index
    %c0_43 = arith.constant 0 : index
    %61 = vector.load %arg6[%c0_42, %c0_43] : memref<80x128xf32, #tpu.memory_space<vmem>>, vector<80x128xf32>
    tpu.vector_store %arg6[%c0_42, %c0_43], %60 {strides = array<i32>} : memref<80x128xf32, #tpu.memory_space<vmem>>, vector<80x128xf32>,
    %c10 = arith.constant 10 : index
    %c0_44 = arith.constant 0 : index
    %62 = vector.load %arg5[%c10, %c0_44] : memref<108x128xf32, #tpu.memory_space<vmem>>, vector<80x128xf32>
    %63 = arith.truncf %62 : vector<80x128xf32> to vector<80x128xbf16>
    %c0_45 = arith.constant 0 : index
    %c0_46 = arith.constant 0 : index
    %64 = vector.load %arg6[%c0_45, %c0_46] : memref<80x128xf32, #tpu.memory_space<vmem>>, vector<80x128xf32>
    %c3 = arith.constant 3 : index
    %c0_47 = arith.constant 0 : index
    %c0_48 = arith.constant 0 : index
    %65 = vector.load %arg2[%c3, %c0_47, %c0_48] : memref<9x128x128xbf16, #tpu.memory_space<vmem>>, vector<1x128x128xbf16>
    %66 = vector.shape_cast %65 : vector<1x128x128xbf16> to vector<128x128xbf16>
    %cst_49 = arith.constant dense<0.000000e+00> : vector<80x128xf32>
    %67 = tpu.matmul %63, %66, %cst_49 {dimension_numbers = #tpu.dot_dimension_numbers<[1], [0], [0], [1], [0, 0, 1, 1], [], []>} : vector<80x128xbf16>, vector<128x128xbf16>, vector<80x128xf32> -> vector<80x128xf32>
    %68 = arith.addf %64, %67 : vector<80x128xf32>
    %c0_50 = arith.constant 0 : index
    %c0_51 = arith.constant 0 : index
    %69 = vector.load %arg6[%c0_50, %c0_51] : memref<80x128xf32, #tpu.memory_space<vmem>>, vector<80x128xf32>
    tpu.vector_store %arg6[%c0_50, %c0_51], %68 {strides = array<i32>} : memref<80x128xf32, #tpu.memory_space<vmem>>, vector<80x128xf32>,
    %c11_52 = arith.constant 11 : index
    %c0_53 = arith.constant 0 : index
    %70 = vector.load %arg5[%c11_52, %c0_53] : memref<108x128xf32, #tpu.memory_space<vmem>>, vector<80x128xf32>
    %71 = arith.truncf %70 : vector<80x128xf32> to vector<80x128xbf16>
    %c0_54 = arith.constant 0 : index
    %c0_55 = arith.constant 0 : index
    %72 = vector.load %arg6[%c0_54, %c0_55] : memref<80x128xf32, #tpu.memory_space<vmem>>, vector<80x128xf32>
    %c4 = arith.constant 4 : index
    %c0_56 = arith.constant 0 : index
    %c0_57 = arith.constant 0 : index
    %73 = vector.load %arg2[%c4, %c0_56, %c0_57] : memref<9x128x128xbf16, #tpu.memory_space<vmem>>, vector<1x128x128xbf16>
    %74 = vector.shape_cast %73 : vector<1x128x128xbf16> to vector<128x128xbf16>
    %cst_58 = arith.constant dense<0.000000e+00> : vector<80x128xf32>
    %75 = tpu.matmul %71, %74, %cst_58 {dimension_numbers = #tpu.dot_dimension_numbers<[1], [0], [0], [1], [0, 0, 1, 1], [], []>} : vector<80x128xbf16>, vector<128x128xbf16>, vector<80x128xf32> -> vector<80x128xf32>
    %76 = arith.addf %72, %75 : vector<80x128xf32>
    %c0_59 = arith.constant 0 : index
    %c0_60 = arith.constant 0 : index
    %77 = vector.load %arg6[%c0_59, %c0_60] : memref<80x128xf32, #tpu.memory_space<vmem>>, vector<80x128xf32>
    tpu.vector_store %arg6[%c0_59, %c0_60], %76 {strides = array<i32>} : memref<80x128xf32, #tpu.memory_space<vmem>>, vector<80x128xf32>,
    %c12 = arith.constant 12 : index
    %c0_61 = arith.constant 0 : index
    %78 = vector.load %arg5[%c12, %c0_61] : memref<108x128xf32, #tpu.memory_space<vmem>>, vector<80x128xf32>
    %79 = arith.truncf %78 : vector<80x128xf32> to vector<80x128xbf16>
    %c0_62 = arith.constant 0 : index
    %c0_63 = arith.constant 0 : index
    %80 = vector.load %arg6[%c0_62, %c0_63] : memref<80x128xf32, #tpu.memory_space<vmem>>, vector<80x128xf32>
    %c5 = arith.constant 5 : index
    %c0_64 = arith.constant 0 : index
    %c0_65 = arith.constant 0 : index
    %81 = vector.load %arg2[%c5, %c0_64, %c0_65] : memref<9x128x128xbf16, #tpu.memory_space<vmem>>, vector<1x128x128xbf16>
    %82 = vector.shape_cast %81 : vector<1x128x128xbf16> to vector<128x128xbf16>
    %cst_66 = arith.constant dense<0.000000e+00> : vector<80x128xf32>
    %83 = tpu.matmul %79, %82, %cst_66 {dimension_numbers = #tpu.dot_dimension_numbers<[1], [0], [0], [1], [0, 0, 1, 1], [], []>} : vector<80x128xbf16>, vector<128x128xbf16>, vector<80x128xf32> -> vector<80x128xf32>
    %84 = arith.addf %80, %83 : vector<80x128xf32>
    %c0_67 = arith.constant 0 : index
    %c0_68 = arith.constant 0 : index
    %85 = vector.load %arg6[%c0_67, %c0_68] : memref<80x128xf32, #tpu.memory_space<vmem>>, vector<80x128xf32>
    tpu.vector_store %arg6[%c0_67, %c0_68], %84 {strides = array<i32>} : memref<80x128xf32, #tpu.memory_space<vmem>>, vector<80x128xf32>,
    %c20 = arith.constant 20 : index
    %c0_69 = arith.constant 0 : index
    %86 = vector.load %arg5[%c20, %c0_69] : memref<108x128xf32, #tpu.memory_space<vmem>>, vector<80x128xf32>
    %87 = arith.truncf %86 : vector<80x128xf32> to vector<80x128xbf16>
    %c0_70 = arith.constant 0 : index
    %c0_71 = arith.constant 0 : index
    %88 = vector.load %arg6[%c0_70, %c0_71] : memref<80x128xf32, #tpu.memory_space<vmem>>, vector<80x128xf32>
    %c6 = arith.constant 6 : index
    %c0_72 = arith.constant 0 : index
    %c0_73 = arith.constant 0 : index
    %89 = vector.load %arg2[%c6, %c0_72, %c0_73] : memref<9x128x128xbf16, #tpu.memory_space<vmem>>, vector<1x128x128xbf16>
    %90 = vector.shape_cast %89 : vector<1x128x128xbf16> to vector<128x128xbf16>
    %cst_74 = arith.constant dense<0.000000e+00> : vector<80x128xf32>
    %91 = tpu.matmul %87, %90, %cst_74 {dimension_numbers = #tpu.dot_dimension_numbers<[1], [0], [0], [1], [0, 0, 1, 1], [], []>} : vector<80x128xbf16>, vector<128x128xbf16>, vector<80x128xf32> -> vector<80x128xf32>
    %92 = arith.addf %88, %91 : vector<80x128xf32>
    %c0_75 = arith.constant 0 : index
    %c0_76 = arith.constant 0 : index
    %93 = vector.load %arg6[%c0_75, %c0_76] : memref<80x128xf32, #tpu.memory_space<vmem>>, vector<80x128xf32>
    tpu.vector_store %arg6[%c0_75, %c0_76], %92 {strides = array<i32>} : memref<80x128xf32, #tpu.memory_space<vmem>>, vector<80x128xf32>,
    %c21_77 = arith.constant 21 : index
    %c0_78 = arith.constant 0 : index
    %94 = vector.load %arg5[%c21_77, %c0_78] : memref<108x128xf32, #tpu.memory_space<vmem>>, vector<80x128xf32>
    %95 = arith.truncf %94 : vector<80x128xf32> to vector<80x128xbf16>
    %c0_79 = arith.constant 0 : index
    %c0_80 = arith.constant 0 : index
    %96 = vector.load %arg6[%c0_79, %c0_80] : memref<80x128xf32, #tpu.memory_space<vmem>>, vector<80x128xf32>
    %c7 = arith.constant 7 : index
    %c0_81 = arith.constant 0 : index
    %c0_82 = arith.constant 0 : index
    %97 = vector.load %arg2[%c7, %c0_81, %c0_82] : memref<9x128x128xbf16, #tpu.memory_space<vmem>>, vector<1x128x128xbf16>
    %98 = vector.shape_cast %97 : vector<1x128x128xbf16> to vector<128x128xbf16>
    %cst_83 = arith.constant dense<0.000000e+00> : vector<80x128xf32>
    %99 = tpu.matmul %95, %98, %cst_83 {dimension_numbers = #tpu.dot_dimension_numbers<[1], [0], [0], [1], [0, 0, 1, 1], [], []>} : vector<80x128xbf16>, vector<128x128xbf16>, vector<80x128xf32> -> vector<80x128xf32>
    %100 = arith.addf %96, %99 : vector<80x128xf32>
    %c0_84 = arith.constant 0 : index
    %c0_85 = arith.constant 0 : index
    %101 = vector.load %arg6[%c0_84, %c0_85] : memref<80x128xf32, #tpu.memory_space<vmem>>, vector<80x128xf32>
    tpu.vector_store %arg6[%c0_84, %c0_85], %100 {strides = array<i32>} : memref<80x128xf32, #tpu.memory_space<vmem>>, vector<80x128xf32>,
    %c22 = arith.constant 22 : index
    %c0_86 = arith.constant 0 : index
    %102 = vector.load %arg5[%c22, %c0_86] : memref<108x128xf32, #tpu.memory_space<vmem>>, vector<80x128xf32>
    %103 = arith.truncf %102 : vector<80x128xf32> to vector<80x128xbf16>
    %c0_87 = arith.constant 0 : index
    %c0_88 = arith.constant 0 : index
    %104 = vector.load %arg6[%c0_87, %c0_88] : memref<80x128xf32, #tpu.memory_space<vmem>>, vector<80x128xf32>
    %c8 = arith.constant 8 : index
    %c0_89 = arith.constant 0 : index
    %c0_90 = arith.constant 0 : index
    %105 = vector.load %arg2[%c8, %c0_89, %c0_90] : memref<9x128x128xbf16, #tpu.memory_space<vmem>>, vector<1x128x128xbf16>
    %106 = vector.shape_cast %105 : vector<1x128x128xbf16> to vector<128x128xbf16>
    %cst_91 = arith.constant dense<0.000000e+00> : vector<80x128xf32>
    %107 = tpu.matmul %103, %106, %cst_91 {dimension_numbers = #tpu.dot_dimension_numbers<[1], [0], [0], [1], [0, 0, 1, 1], [], []>} : vector<80x128xbf16>, vector<128x128xbf16>, vector<80x128xf32> -> vector<80x128xf32>
    %108 = arith.addf %104, %107 : vector<80x128xf32>
    %c0_92 = arith.constant 0 : index
    %c0_93 = arith.constant 0 : index
    %109 = vector.load %arg6[%c0_92, %c0_93] : memref<80x128xf32, #tpu.memory_space<vmem>>, vector<80x128xf32>
    tpu.vector_store %arg6[%c0_92, %c0_93], %108 {strides = array<i32>} : memref<80x128xf32, #tpu.memory_space<vmem>>, vector<80x128xf32>,
    %110 = tpu.iota {dimensions = array<i32: 0>} : vector<80x1xi32>
    %c10_i32 = arith.constant 10 : i32
    %c0_i32 = arith.constant 0 : i32
    %111 = arith.cmpi eq, %c10_i32, %c0_i32 : i32
    %c1_i32 = arith.constant 1 : i32
    %112 = arith.select %111, %c1_i32, %c10_i32 : i32
    %113 = vector.broadcast %112 : i32 to vector<80x1xi32>
    %114 = arith.remsi %110, %113 : vector<80x1xi32>
    %c0_i32_94 = arith.constant 0 : i32
    %115 = vector.broadcast %c0_i32_94 : i32 to vector<80x1xi32>
    %116 = arith.cmpi ne, %114, %115 : vector<80x1xi32>
    %c0_i32_95 = arith.constant 0 : i32
    %117 = vector.broadcast %c0_i32_95 : i32 to vector<80x1xi32>
    %118 = arith.cmpi slt, %114, %117 : vector<80x1xi32>
    %c0_i32_96 = arith.constant 0 : i32
    %119 = arith.cmpi slt, %112, %c0_i32_96 : i32
    %120 = vector.broadcast %119 : i1 to vector<80x1xi1>
    %121 = vector.broadcast %120 : vector<80x1xi1> to vector<80x1xi1>
    %122 = arith.xori %118, %121 : vector<80x1xi1>
    %123 = arith.andi %122, %116 : vector<80x1xi1>
    %124 = vector.broadcast %112 : i32 to vector<80x1xi32>
    %125 = arith.addi %114, %124 : vector<80x1xi32>
    %126 = arith.select %123, %125, %114 : vector<80x1xi1>, vector<80x1xi32>
    %c8_i32 = arith.constant 8 : i32
    %127 = vector.broadcast %c8_i32 : i32 to vector<80x1xi32>
    %128 = arith.cmpi slt, %126, %127 : vector<80x1xi32>
    %c0_97 = arith.constant 0 : index
    %c0_98 = arith.constant 0 : index
    %129 = vector.load %arg6[%c0_97, %c0_98] : memref<80x128xf32, #tpu.memory_space<vmem>>, vector<80x128xf32>
    %cst_99 = arith.constant 0.000000e+00 : f32
    %130 = vector.shape_cast %128 : vector<80x1xi1> to vector<80x1xi1>
    %131 = vector.broadcast %130 : vector<80x1xi1> to vector<80x128xi1>
    %132 = vector.broadcast %cst_99 : f32 to vector<80x128xf32>
    %133 = arith.select %131, %129, %132 : vector<80x128xi1>, vector<80x128xf32>
    %c0_100 = arith.constant 0 : index
    %c0_101 = arith.constant 0 : index
    %c0_102 = arith.constant 0 : index
    %134 = vector.load %arg3[%c0_100, %c0_101, %c0_102] : memref<1x80x128xf32, #tpu.memory_space<vmem>>, vector<1x80x128xf32>
    %135 = vector.shape_cast %134 : vector<1x80x128xf32> to vector<80x128xf32>
    %136 = vector.shape_cast %133 : vector<80x128xf32> to vector<1x80x128xf32>
    tpu.vector_store %arg3[%c0_100, %c0_101, %c0_102], %136 {strides = array<i32>} : memref<1x80x128xf32, #tpu.memory_space<vmem>>, vector<1x80x128xf32>,
    %cst_103 = arith.constant dense<0.000000e+00> : vector<128xf32>
    %137 = vector.multi_reduction <add>, %133, %cst_103 [0] : vector<80x128xf32> to vector<128xf32>
    %138 = vector.shape_cast %137 : vector<128xf32> to vector<1x128xf32>
    %139 = arith.mulf %133, %133 : vector<80x128xf32>
    %cst_104 = arith.constant dense<0.000000e+00> : vector<128xf32>
    %140 = vector.multi_reduction <add>, %139, %cst_104 [0] : vector<80x128xf32> to vector<128xf32>
    %141 = vector.shape_cast %140 : vector<128xf32> to vector<1x128xf32>
    %142 = tpu.concatenate %138, %141 in 0 : vector<1x128xf32>, vector<1x128xf32> -> vector<2x128xf32>
    %c0_105 = arith.constant 0 : index
    %c0_106 = arith.constant 0 : index
    %c0_107 = arith.constant 0 : index
    %143 = vector.load %arg4[%c0_105, %c0_106, %c0_107] : memref<1x2x128xf32, #tpu.memory_space<vmem>>, vector<1x2x128xf32>
    %144 = vector.shape_cast %143 : vector<1x2x128xf32> to vector<2x128xf32>
    %145 = vector.shape_cast %142 : vector<2x128xf32> to vector<1x2x128xf32>
    tpu.vector_store %arg4[%c0_105, %c0_106, %c0_107], %145 {strides = array<i32>} : memref<1x2x128xf32, #tpu.memory_space<vmem>>, vector<1x2x128xf32>,
    return
  }
  func.func @transform_0(%arg0: i32) -> (i32, i32, i32, i32) {
    %c0_i32 = arith.constant 0 : i32
    %c0_i32_0 = arith.constant 0 : i32
    %c0_i32_1 = arith.constant 0 : i32
    %c0_i32_2 = arith.constant 0 : i32
    return %arg0, %c0_i32, %c0_i32_0, %c0_i32_1 : i32, i32, i32, i32
  }
  func.func @transform_1(%arg0: i32) -> (i32, i32, i32) {
    %c0_i32 = arith.constant 0 : i32
    %c0_i32_0 = arith.constant 0 : i32
    %c0_i32_1 = arith.constant 0 : i32
    %c0_i32_2 = arith.constant 0 : i32
    return %c0_i32, %c0_i32_0, %c0_i32_1 : i32, i32, i32
  }
  func.func @transform_2(%arg0: i32) -> (i32, i32, i32) {
    %c0_i32 = arith.constant 0 : i32
    %c0_i32_0 = arith.constant 0 : i32
    %c0_i32_1 = arith.constant 0 : i32
    return %arg0, %c0_i32, %c0_i32_0 : i32, i32, i32
  }
  func.func @transform_3(%arg0: i32) -> (i32, i32, i32) {
    %c0_i32 = arith.constant 0 : i32
    %c0_i32_0 = arith.constant 0 : i32
    %c0_i32_1 = arith.constant 0 : i32
    return %arg0, %c0_i32, %c0_i32_0 : i32, i32, i32
  }
}

</mosaic_0001>

<bundles_post_ra>
// kernel: tpu_custom_call.1
= control target key start
LH: loop header
LB: loop body
LE: loop exit
PB: predicated region body
PF: predicated region fallthrough
CT: control target
= control target key end

     0   :  { %9 = vsyncpa [#allocation5], 0  ;;  %s3525_s0 = inlined_call_operand.hbm [shape: bf16[16,2,8,256], index: 0, kind: input, shape index: {}]   ;;  %s3526_s1 = inlined_call_operand.hbm [shape: bf16[9,128,128], index: 1, kind: input, shape index: {}]   ;;  %s3527_s2 = inlined_call_operand.hbm [shape: f32[2,80,128], index: 2, kind: output, shape index: {0}]   ;;  %s3528_s3 = inlined_call_operand.hbm [shape: f32[2,2,128], index: 3, kind: output, shape index: {1}]  }
   0x1   :  { %11 = vsyncpa [#allocation5 + $0x1], 0 }
   0x2   :  { %12 = vsyncpa [#allocation8], 0 }
   0x3   :  { %13 = vsyncpa [#allocation6], 0 }
   0x4   :  { %15 = vsyncpa [#allocation6 + $0x1], 0 }
   0x5   :  { %16 = vsyncpa [#allocation11], 0 }
   0x6   :  { %18 = vsyncpa [#allocation11 + $0x1], 0  ;;  %s2949_s12 = smov 0   ;;  %s2951_s13 = smov 0  }
   0x7   :  { %s2953_s14 = smov 0   ;;  %s2955_s15 = smov 0  }
   0x8 LB: > { %s2970_s16 = sadd.s32 4294967295, %s2918_s15   ;;  %s2289_s17 = sadd.s32 4294967294, %s2918_s15   ;;  %s2918_s15 = sphi %s2955_s15, %s3562_s15   ;;  %s2914_s14 = sphi %s2953_s14, %s3561_s14   ;;  %s2910_s13 = sphi %s2951_s13, %s3560_s13   ;;  %s2906_s12 = sphi %s2949_s12, %s3559_s12  }
   0x9   : > { %p44_p0 = scmp.ne.s32.totalorder %s2910_s13, %s2906_s12  ;;  %p45_p1 = scmp.eq.s32.totalorder %s2970_s16, 0 }
   0xa   : > { %p89_p2 = scmp.eq.s32.totalorder %s2970_s16, 1  ;;  %p95_p3 = scmp.eq.s32.totalorder %s2289_s17, 1 }
   0xb   : > { %p2979_p4 = por %p45_p1, %p44_p0  ;;  %p2290_p5 = scmp.ge.s32.totalorder %s2918_s15, 1 }
   0xc   : > { %p2984_p6 = por %p95_p3, %p44_p0  ;;  %p128_p7 = scmp.lt.s32.totalorder %s2918_s15, 3 }
   0xd   : > { %s139_s22 = sshll.u32 %s3526_s1, 4  ;;  %s2920_s24 = smov [#allocation7]   ;;  %s140_s22 = int_to_ptr.hbm [resolvable:$true] %s139_s22 }
   0xe   : > { %p2992_p8 = pnand %p2290_p5, %p128_p7  ;;  %s141_s25 = sshll.u32 %s2920_s24, 4  ;;  %s142_s25 = int_to_ptr.vmem [resolvable:$true] %s141_s25 }
   0xf   : > { %s3002_s26 = sadd.s32 1, %s2918_s15   ;;  %s2921_s27 = smov 64  }
  0x10   : > { %p2696_p9 = pneg %p2992_p8  ;;  %s2922_s28 = smov 4  }
  0x11   : > { %s28_s29 = ssub.s32 %s2918_s15, %s3002_s26  ;;  %s31_s30 = sadd.s32 1, %s2914_s14 }
  0x12   : > { %p2697_p10 = pnand %p2696_p9, %p45_p1  ;;  %p29_p12 = scmp.eq.s32.totalorder %s28_s29, 0 }
  0x13   : > { %p38_p13 = scmp.ne.s32.totalorder %s2914_s14, %s2910_s13  ;;  %p39_p0 = scmp.eq.s32.totalorder %s2918_s15, 0 }
  0x14   : > { %2699 = dma.hbm_to_vmem [thread:$0]  (!%p2697_p10), %s140_s22, 9216, %s142_s25, [#allocation8], %s2921_s27, %s2921_s27, %s2922_s28  }
  0x15   : > { %p2712_p3 = scmp.lt.s32.totalorder %s2918_s15, 2  ;;  %p40_p5 = por %p39_p0, %p38_p13 }
  0x16   : > { %s3012_s4 = scalar_select %p29_p12, %s2914_s14, %s31_s30  }
  0x17   : > { %p3016_p7 = por %p89_p2, %p38_p13  ;;  %s155_s6 = sand.u32 1, %s2914_s14  }
  0x18   : > { %s2595_s7 = sshll.u32 %s2918_s15, 7  ;;  %s2293_s8 = sshll.u32 %s155_s6, 7 }
  0x19   : > { %s165_s11 = scalar_lea.hbm %s3525_s0, %s2595_s7  ;;  %s159_s20 = scalar_lea.vmem [#allocation4], %s2293_s8 }
  0x1a   : > { %s166_s17 = sshll.u32 %s165_s11, 4  ;;  %s168_s21 = sshll.u32 %s159_s20, 4  ;;  %s167_s17 = int_to_ptr.hbm [resolvable:$true] %s166_s17  ;;  %s169_s21 = int_to_ptr.vmem [resolvable:$true] %s168_s21 }
  0x1b   : > { %p3027_p9 = pnand %p2712_p3, %p40_p5  ;;  %s156_s24 = scalar_lea.sflag [#allocation5], %s155_s6 }
  0x1c   : > { %s2786_s25 = sshra.s32 %s167_s17, 4  ;;  %s2793_s30 = scalar_lea.hbm %s3525_s0, 256  ;;  %s2787_s25 = int_to_ptr.hbm [resolvable:$true] %s2786_s25 }
  0x1d   : > { %s2788_s27 = scalar_lea.hbm %s2787_s25, 128  ;;  %p2790_p10 = pneg %p3027_p9 }
  0x1e   : > { %p2789_p2 = scmp.ne.s32.totalorder %s2787_s25, %s2788_s27  ;;  %p2794_p0 = scmp.lt.s32.totalorder %s2787_s25, %s3525_s0 }
  0x1f   : > { %p2795_p3 = scmp.lt.s32.totalorder %s2793_s30, %s2788_s27 }
  0x20   : > { %p2791_p12 = pnand %p2790_p10, %p2789_p2 }
  0x21   : > { %p2796_p5 = por %p2795_p3, %p2794_p0 }
  0x22   : > { %p2792_p13 = pneg %p2791_p12 }
  0x24   : > { %p2797_p11 = pnand %p2796_p5, %p2792_p13 }
  0x26   : > { %2800 = shalt.err (!%p2797_p11)
}
  0x27   : > { %s2923_s6 = smov 128   ;;  %s2924_s9 = smov 8  }
  0x28   : > { %2703 = dma.hbm_to_vmem [thread:$0]  (!%p3027_p9), %s167_s17, 2048, %s169_s21, %s156_s24, %s2923_s6, %s2923_s6, %s2924_s9  }
  0x29   : > { %180 = sbr.rel (%p2992_p8) target bundleno = 427 (0x1ab), region = 28  ;;  %s3044_s10 = sand.u32 (!%p2992_p8), 1, %s2910_s13  }
  0x2a   : > { %s2298_s11 = sshll.u32 (!%p2992_p8), %s3044_s10, 7  ;;  %s183_s20 = scalar_lea.sflag (!%p2992_p8), [#allocation5], %s3044_s10 }
  0x2b   : > { %s3048_s25 = scalar_lea.vmem (!%p2992_p8), [#allocation4], %s2298_s11 }
  0x2e   : > { %2889 = dma.done.wait (%p2979_p4), %s183_s20, 2048  }
  0x2f   : > { %2891 = vsyncadd (%p2979_p4), %s183_s20, 4294965248 }
  0x30   : > { %2893 = dma.done.wait (%p45_p1), [#allocation8], 9216  }
  0x31   : > { %2895 = vsyncadd (%p45_p1), [#allocation8], 4294958080  ;;  %v2925_v0 = vmov 0.0   ;;  %v2603_v1 = vld [vmem:[#allocation7 + $0x38] sm:$0xff]  ;;  %v2602_v2 = vld [vmem:[#allocation7 + $0x30] sm:$0xff]  ;;  %s2684_s18 = smul.u32 80, %s3044_s10 }
  0x32   : > { %357 = vst [vmem:[#allocation2] sm:$0xff] %v2925_v0  ;;  %478 = vmatpush.bf16.msra.mxu0 %v2603_v1  ;;  %2668 = vmatpush.bf16.msra.mxu1 %v2603_v1  ;;  %v2627_v3 = vld [vmem:[#allocation7 + $0xf8] sm:$0xff]  ;;  %v2626_v4 = vld [vmem:[#allocation7 + $0xf0] sm:$0xff]  ;;  %v221_v5 = vld [vmem:[%s3048_s25] sm:$0xff]  ;;  %s2685_s17 = smul.u32 80, %s2970_s16  ;;  %s2139_s29 = scalar_lea.sflag [#allocation6], %s3044_s10 }
  0x33   : > { %358 = vst [vmem:[#allocation2 + $0x8] sm:$0xff] %v2925_v0  ;;  %2669 = vmatpush.bf16.msra.mxu2 %v2603_v1  ;;  %910 = vmatpush.bf16.msra.mxu3 %v2627_v3  ;;  %v222_v6 = vld [vmem:[%s3048_s25 + $0x8] sm:$0xff]  ;;  %v237_v7 = vunpack.c.l.bf16 %v221_v5  ;;  %v238_v8 = vunpack.c.h.bf16 %v221_v5  ;;  %v225_v9 = vld [vmem:[%s3048_s25 + $0x20] sm:$0xff]  ;;  %v227_v13 = vld [vmem:[%s3048_s25 + $0x30] sm:$0xff]  ;;  %s3320_s23 = scalar_lea.vmem [#allocation9], %s2684_s18  ;;  %s2836_s9 = scalar_lea.hbm %s3527_s2, 160 }
  0x34   : > { %359 = vst [vmem:[#allocation2 + $0x10] sm:$0xff] %v2925_v0  ;;  %v226_v10 = vld [vmem:[%s3048_s25 + $0x28] sm:$0xff]  ;;  %v253_v11 = vunpack.c.l.bf16 %v222_v6  ;;  %v254_v12 = vunpack.c.h.bf16 %v222_v6  ;;  %v228_v14 = vld [vmem:[%s3048_s25 + $0x38] sm:$0xff]  ;;  %v241_v15 = vunpack.c.l.bf16 %v225_v9  ;;  %v242_v16 = vunpack.c.h.bf16 %v225_v9  ;;  %v231_v26 = vld [vmem:[%s3048_s25 + $0x50] sm:$0xff]  ;;  %s2155_s24 = scalar_lea.hbm %s3527_s2, %s2685_s17  ;;  %s2156_s27 = sshll.u32 %s3320_s23, 4  ;;  %s2157_s27 = int_to_ptr.vmem [resolvable:$true] %s2156_s27 }
  0x35   : > { %360 = vst [vmem:[#allocation2 + $0x18] sm:$0xff] %v2925_v0  ;;  %v2601_v17 = vld [vmem:[#allocation7 + $0x28] sm:$0xff]  ;;  %v243_v18 = vunpack.c.l.bf16 %v227_v13  ;;  %v244_v19 = vunpack.c.h.bf16 %v227_v13  ;;  %v257_v20 = vunpack.c.l.bf16 %v226_v10  ;;  %v258_v21 = vunpack.c.h.bf16 %v226_v10  ;;  %v232_v27 = vld [vmem:[%s3048_s25 + $0x58] sm:$0xff]  ;;  %v233_v31 = vld [vmem:[%s3048_s25 + $0x60] sm:$0xff]  ;;  %s2158_s28 = sshll.u32 %s2155_s24, 4  ;;  %s2159_s28 = int_to_ptr.hbm [resolvable:$true] %s2158_s28 }
  0x36   : > { %361 = vst [vmem:[#allocation2 + $0x20] sm:$0xff] %v2925_v0  ;;  %479 = vmatpush.bf16.msra.mxu0 %v2602_v2  ;;  %2670 = vmatpush.bf16.msra.mxu1 %v2602_v2  ;;  %v269_v22 = vmax.f32 %v237_v7, %v253_v11  ;;  %v270_v23 = vmax.f32 %v238_v8, %v254_v12  ;;  %v259_v24 = vunpack.c.l.bf16 %v228_v14  ;;  %v260_v25 = vunpack.c.h.bf16 %v228_v14  ;;  %v2625_v30 = vld [vmem:[#allocation7 + $0xe8] sm:$0xff]  ;;  %v2600_v39 = vld [vmem:[#allocation7 + $0x20] sm:$0xff]  ;;  %v223_v48 = vld [vmem:[%s3048_s25 + $0x10] sm:$0xff]  ;;  %s2830_s30 = sshra.s32 %s2159_s28, 4  ;;  %s2831_s30 = int_to_ptr.hbm [resolvable:$true] %s2830_s30 }
  0x37   : > { %362 = vst [vmem:[#allocation2 + $0x28] sm:$0xff] %v2925_v0  ;;  %2671 = vmatpush.bf16.msra.mxu2 %v2602_v2  ;;  %911 = vmatpush.bf16.msra.mxu3 %v2626_v4  ;;  %v273_v28 = vmax.f32 %v241_v15, %v257_v20  ;;  %v274_v29 = vmax.f32 %v242_v16, %v258_v21  ;;  %v234_v32 = vld [vmem:[%s3048_s25 + $0x68] sm:$0xff]  ;;  %v247_v33 = vunpack.c.l.bf16 %v231_v26  ;;  %v248_v34 = vunpack.c.h.bf16 %v231_v26  ;;  %v224_v49 = vld [vmem:[%s3048_s25 + $0x18] sm:$0xff]  ;;  %v2624_v51 = vld [vmem:[#allocation7 + $0xe0] sm:$0xff]  ;;  %s2832_s7 = scalar_lea.hbm %s2831_s30, 80  ;;  %p2837_p11 = scmp.lt.s32.totalorder %s2831_s30, %s3527_s2 }
  0x38   : > { %363 = vst [vmem:[#allocation2 + $0x30] sm:$0xff] %v2925_v0  ;;  %v285_v35 = vpack.c.bf16 %v270_v23, %v269_v22  ;;  %v275_v36 = vmax.f32 %v243_v18, %v259_v24  ;;  %v276_v37 = vmax.f32 %v244_v19, %v260_v25  ;;  %v249_v38 = vunpack.c.l.bf16 %v233_v31  ;;  %v229_v59 = vld [vmem:[%s3048_s25 + $0x40] sm:$0xff]  ;;  %v2599_v60 = vld [vmem:[#allocation7 + $0x18] sm:$0xff]  ;;  %v230_v6 = vld [vmem:[%s3048_s25 + $0x48] sm:$0xff]  ;;  %p2833_p1 = scmp.ne.s32.totalorder %s2831_s30, %s2832_s7  ;;  %p2838_p9 = scmp.lt.s32.totalorder %s2836_s9, %s2832_s7 }
  0x39   : > { %364 = vst [vmem:[#allocation2 + $0x38] sm:$0xff] %v2925_v0  ;;  %v287_v40 = vpack.c.bf16 %v274_v29, %v273_v28  ;;  %v250_v41 = vunpack.c.h.bf16 %v233_v31  ;;  %v263_v42 = vunpack.c.l.bf16 %v232_v27  ;;  %v264_v43 = vunpack.c.h.bf16 %v232_v27  ;;  %v2623_v9 = vld [vmem:[#allocation7 + $0xd8] sm:$0xff]  ;;  %v2598_v16 = vld [vmem:[#allocation7 + $0x10] sm:$0xff] }
  0x3a   : > { %365 = vst [vmem:[#allocation2 + $0x40] sm:$0xff] %v2925_v0  ;;  %480 = vmatpush.bf16.msra.mxu0 %v2601_v17  ;;  %2672 = vmatpush.bf16.msra.mxu1 %v2601_v17  ;;  %v309_v44 = vrot.slane %v285_v35, 4  ;;  %v288_v45 = vpack.c.bf16 %v276_v37, %v275_v36  ;;  %v265_v46 = vunpack.c.l.bf16 %v234_v32  ;;  %v266_v47 = vunpack.c.h.bf16 %v234_v32  ;;  %v2622_v27 = vld [vmem:[#allocation7 + $0xd0] sm:$0xff]  ;;  %p2834_p4 = pnand %p2833_p1, %p3016_p7  ;;  %p2839_p2 = por %p2838_p9, %p2837_p11 }
  0x3b   : > { %366 = vst [vmem:[#allocation2 + $0x48] sm:$0xff] %v2925_v0  ;;  %2673 = vmatpush.bf16.msra.mxu2 %v2601_v17  ;;  %v311_v50 = vrot.slane %v287_v40, 4  ;;  %912 = vmatpush.bf16.msra.mxu3 %v2625_v30  ;;  %v279_v52 = vmax.f32 %v247_v33, %v263_v42  ;;  %v280_v53 = vmax.f32 %v248_v34, %v264_v43  ;;  %v239_v54 = vunpack.c.l.bf16 %v223_v48  ;;  %v2597_v33 = vld [vmem:[#allocation7 + $0x8] sm:$0xff]  ;;  %v2596_v43 = vld [vmem:[#allocation7] sm:$0xff] }
  0x3c   : > { %367 = vst [vmem:[#allocation2 + $0x50] sm:$0xff] %v2925_v0  ;;  %v325_v55 = vunpack.c.l.bf16 %v309_v44  ;;  %v312_v56 = vrot.slane %v288_v45, 4  ;;  %v281_v57 = vmax.f32 %v249_v38, %v265_v46  ;;  %v282_v58 = vmax.f32 %v250_v41, %v266_v47  ;;  %v2621_v40 = vld [vmem:[#allocation7 + $0xc8] sm:$0xff]  ;;  %v2611_v45 = vld [vmem:[#allocation7 + $0x78] sm:$0xff]  ;;  %p2835_p8 = pneg %p2834_p4 }
  0x3d   : > { %368 = vst [vmem:[#allocation2 + $0x58] sm:$0xff] %v2925_v0  ;;  %v327_v61 = vunpack.c.l.bf16 %v311_v50  ;;  %v290_v62 = vpack.c.bf16 %v280_v53, %v279_v52  ;;  %v240_v63 = vunpack.c.h.bf16 %v223_v48  ;;  %v255_v1 = vunpack.c.l.bf16 %v224_v49  ;;  %v2619_v47 = vld [vmem:[#allocation7 + $0xb8] sm:$0xff] }
  0x3e   : > { %369 = vst [vmem:[#allocation2 + $0x60] sm:$0xff] %v2925_v0  ;;  %481 = vmatpush.bf16.msra.mxu0 %v2600_v39  ;;  %2674 = vmatpush.bf16.msra.mxu1 %v2600_v39  ;;  %v333_v2 = vmax.f32 %v269_v22, %v325_v55  ;;  %v328_v3 = vunpack.c.l.bf16 %v312_v56  ;;  %v291_v4 = vpack.c.bf16 %v282_v58, %v281_v57  ;;  %v256_v5 = vunpack.c.h.bf16 %v224_v49  ;;  %v2635_v49 = vld [vmem:[#allocation7 + $0x138] sm:$0xff]  ;;  %v2620_v56 = vld [vmem:[#allocation7 + $0xc0] sm:$0xff]  ;;  %v2610_v58 = vld [vmem:[#allocation7 + $0x70] sm:$0xff]  ;;  %p2840_p10 = pnand %p2839_p2, %p2835_p8 }
  0x3f   : > { %2675 = vmatpush.bf16.msra.mxu2 %v2600_v39  ;;  %v335_v7 = vmax.f32 %v273_v28, %v327_v61  ;;  %913 = vmatpush.bf16.msra.mxu3 %v2624_v51  ;;  %v314_v8 = vrot.slane %v290_v62, 4  ;;  %v271_v10 = vmax.f32 %v239_v54, %v255_v1  ;;  %v245_v11 = vunpack.c.l.bf16 %v229_v59  ;;  %v2634_v61 = vld [vmem:[#allocation7 + $0x130] sm:$0xff] }
  0x40   : > { %v341_v12 = vpack.c.bf16 %v333_v2, %v333_v2  ;;  %v336_v13 = vmax.f32 %v275_v36, %v328_v3  ;;  %v315_v14 = vrot.slane %v291_v4, 4  ;;  %v272_v15 = vmax.f32 %v240_v63, %v256_v5  ;;  %v2609_v3 = vld [vmem:[#allocation7 + $0x68] sm:$0xff]  ;;  %v2658_v4 = vld [vmem:[#allocation7 + $0x1f0] sm:$0xff] }
  0x41   : > { %v343_v17 = vpack.c.bf16 %v335_v7, %v335_v7  ;;  %v330_v18 = vunpack.c.l.bf16 %v314_v8  ;;  %v246_v19 = vunpack.c.h.bf16 %v229_v59  ;;  %v261_v20 = vunpack.c.l.bf16 %v230_v6  ;;  %v2659_v59 = vld [vmem:[#allocation7 + $0x1f8] sm:$0xff]  ;;  %v2617_v5 = vld [vmem:[#allocation7 + $0xa8] sm:$0xff] }
  0x42   : > { %482 = vmatpush.bf16.msra.mxu0 %v2599_v60  ;;  %2676 = vmatpush.bf16.msra.mxu1 %v2599_v60  ;;  %v3085_v21 = vunpack.c.l.bf16 %v341_v12  ;;  %v344_v22 = vpack.c.bf16 %v336_v13, %v336_v13  ;;  %v331_v23 = vunpack.c.l.bf16 %v315_v14  ;;  %v286_v24 = vpack.c.bf16 %v272_v15, %v271_v10  ;;  %v2632_v12 = vld [vmem:[#allocation7 + $0x120] sm:$0xff] }
  0x43   : > { %2677 = vmatpush.bf16.msra.mxu2 %v2599_v60  ;;  %v351_v25 = vunpack.c.l.bf16 %v343_v17  ;;  %v338_v26 = vmax.f32 %v279_v52, %v330_v18  ;;  %914 = vmatpush.bf16.msra.mxu3 %v2623_v9  ;;  %v262_v28 = vunpack.c.h.bf16 %v230_v6  ;;  %v277_v29 = vmax.f32 %v245_v11, %v261_v20  ;;  %v2618_v60 = vld [vmem:[#allocation7 + $0xb0] sm:$0xff]  ;;  %v2633_v6 = vld [vmem:[#allocation7 + $0x128] sm:$0xff]  ;;  %v2608_v9 = vld [vmem:[#allocation7 + $0x60] sm:$0xff] }
  0x44   : > { %371 = vst [vmem:[#allocation2 + $0xb] sm:$0xff] %v3085_v21  ;;  %v3088_v30 = vunpack.c.l.bf16 %v344_v22  ;;  %v339_v31 = vmax.f32 %v281_v57, %v331_v23  ;;  %v310_v32 = vrot.slane %v286_v24, 4  ;;  %v2616_v11 = vld [vmem:[#allocation7 + $0xa0] sm:$0xff]  ;;  %v2607_v17 = vld [vmem:[#allocation7 + $0x58] sm:$0xff]  ;;  %v2606_v23 = vld [vmem:[#allocation7 + $0x50] sm:$0xff] }
  0x45   : > { %373 = vst [vmem:[#allocation2 + $0x1f] sm:$0xff] %v351_v25  ;;  %v346_v34 = vpack.c.bf16 %v338_v26, %v338_v26  ;;  %v278_v35 = vmax.f32 %v246_v19, %v262_v28  ;;  %v2615_v18 = vld [vmem:[#allocation7 + $0x98] sm:$0xff]  ;;  %v2614_v24 = vld [vmem:[#allocation7 + $0x90] sm:$0xff]  ;;  %v2657_v26 = vld [vmem:[#allocation7 + $0x1e8] sm:$0xff] }
  0x46   : > { %483 = vmatpush.bf16.msra.mxu0 %v2598_v16  ;;  %2678 = vmatpush.bf16.msra.mxu1 %v2598_v16  ;;  %374 = vst [vmem:[#allocation2 + $0x29] sm:$0xff] %v3088_v30  ;;  %v347_v36 = vpack.c.bf16 %v339_v31, %v339_v31  ;;  %v326_v37 = vunpack.c.l.bf16 %v310_v32  ;;  %v2631_v19 = vld [vmem:[#allocation7 + $0x118] sm:$0xff]  ;;  %v2630_v25 = vld [vmem:[#allocation7 + $0x110] sm:$0xff]  ;;  %v2613_v31 = vld [vmem:[#allocation7 + $0x88] sm:$0xff] }
  0x47   : > { %2679 = vmatpush.bf16.msra.mxu2 %v2598_v16  ;;  %v3091_v38 = vunpack.c.l.bf16 %v346_v34  ;;  %915 = vmatpush.bf16.msra.mxu3 %v2622_v27  ;;  %v289_v39 = vpack.c.bf16 %v278_v35, %v277_v29  ;;  %v2629_v32 = vld [vmem:[#allocation7 + $0x108] sm:$0xff]  ;;  %v2604_v34 = vld [vmem:[#allocation7 + $0x40] sm:$0xff] }
  0x48   : > { %v355_v41 = vunpack.c.l.bf16 %v347_v36  ;;  %v334_v42 = vmax.f32 %v271_v10, %v326_v37  ;;  %v2612_v35 = vld [vmem:[#allocation7 + $0x80] sm:$0xff]  ;;  %v676_v36 = vld [vmem:[#allocation2 + $0x2] sm:$0xff] }
  0x49   : > { %376 = vst [vmem:[#allocation2 + $0x3d] sm:$0xff] %v3091_v38  ;;  %v313_v44 = vrot.slane %v289_v39, 4  ;;  %v2628_v37 = vld [vmem:[#allocation7 + $0x100] sm:$0xff]  ;;  %v2651_v39 = vld [vmem:[#allocation7 + $0x1b8] sm:$0xff] }
  0x4a   : > { %484 = vmatpush.bf16.msra.mxu0 %v2597_v33  ;;  %2680 = vmatpush.bf16.msra.mxu1 %v2597_v33  ;;  %377 = vst [vmem:[#allocation2 + $0x47] sm:$0xff] %v355_v41  ;;  %v342_v46 = vpack.c.bf16 %v334_v42, %v334_v42  ;;  %v2643_v41 = vld [vmem:[#allocation7 + $0x178] sm:$0xff] }
  0x4b   : > { %2681 = vmatpush.bf16.msra.mxu2 %v2597_v33  ;;  %v390_v48 = vld [vmem:[#allocation2 + $0x8] sm:$0xff]  ;;  %v329_v50 = vunpack.c.l.bf16 %v313_v44  ;;  %916 = vmatpush.bf16.msra.mxu3 %v2621_v40 }
  0x4c   : > { %v399_v51 = vpack.c.bf16 %v390_v48, %v2925_v0  ;;  %v393_v52 = vld [vmem:[#allocation2 + $0x20] sm:$0xff]  ;;  %v3095_v53 = vunpack.c.l.bf16 %v342_v46  ;;  %v3101_v7 = vld [vmem:[#allocation2 + $0xa] sm:$0xff] }
  0x4d   : > { %v394_v54 = vld [vmem:[#allocation2 + $0x28] sm:$0xff]  ;;  %v337_v55 = vmax.f32 %v277_v29, %v329_v50  ;;  %v2605_v29 = vld [vmem:[#allocation7 + $0x48] sm:$0xff]  ;;  %v2650_v48 = vld [vmem:[#allocation7 + $0x1b0] sm:$0xff] }
  0x4e   : > { %485 = vmatpush.bf16.msra.mxu0 %v2596_v43  ;;  %2682 = vmatpush.bf16.msra.mxu1 %v2596_v43  ;;  %v401_v57 = vpack.c.bf16 %v394_v54, %v393_v52  ;;  %372 = vst [vmem:[#allocation2 + $0x15] sm:$0xff] %v3095_v53  ;;  %v3109_v28 = vld [vmem:[#allocation2 + $0x22] sm:$0xff]  ;;  %v2656_v54 = vld [vmem:[#allocation7 + $0x1e0] sm:$0xff] }
  0x4f   : > { %2683 = vmatpush.bf16.msra.mxu2 %v2596_v43  ;;  %v345_v0 = vpack.c.bf16 %v337_v55, %v337_v55  ;;  %917 = vmatpush.bf16.msra.mxu3 %v2620_v56  ;;  %v532_v40 = vld [vmem:[#allocation2 + $0x1] sm:$0xff]  ;;  %v533_v42 = vld [vmem:[#allocation2 + $0x9] sm:$0xff] }
  0x50   : > { %v2667_v44 = vld [vmem:[#allocation7 + $0x238] sm:$0xff]  ;;  %v542_v46 = vpack.c.bf16 %v533_v42, %v532_v40  ;;  %v235_v50 = vld [vmem:[%s3048_s25 + $0x70] sm:$0xff]  ;;  %v2644_v42 = vld [vmem:[#allocation7 + $0x180] sm:$0xff] }
  0x51   : > { %486 = vmatmul.bf16.vlgmr.msra.gmra.mxu0 %v399_v51  ;;  %496 = vmatmul.bf16.vlgmr.msra.gmra.mxu1 %v401_v57  ;;  %v397_v62 = vld [vmem:[#allocation2 + $0x40] sm:$0xff]  ;;  %v398_v63 = vld [vmem:[#allocation2 + $0x48] sm:$0xff]  ;;  %v3098_v1 = vunpack.c.l.bf16 %v345_v0  ;;  %v251_v55 = vunpack.c.l.bf16 %v235_v50  ;;  %v252_v56 = vunpack.c.h.bf16 %v235_v50 }
  0x52   : > { %622 = vmatpush.bf16.msrb.mxu1 %v2611_v45  ;;  %1054 = vmatpush.bf16.msrb.mxu0 %v2635_v49  ;;  %v403_v2 = vpack.c.bf16 %v398_v63, %v397_v62  ;;  %v686_v45 = vpack.c.bf16 %v3101_v7, %v676_v36  ;;  %v2642_v49 = vld [vmem:[#allocation7 + $0x170] sm:$0xff]  ;;  %v236_v51 = vld [vmem:[%s3048_s25 + $0x78] sm:$0xff]  ;;  %v2665_v63 = vld [vmem:[#allocation7 + $0x228] sm:$0xff] }
  0x53   : > { %766 = vmatpush.bf16.msrb.mxu2 %v2619_v47  ;;  %1486 = vmatpush.bf16.msrb.mxu3 %v2659_v59  ;;  %375 = vst [vmem:[#allocation2 + $0x33] sm:$0xff] %v3098_v1  ;;  %v2666_v52 = vld [vmem:[#allocation7 + $0x230] sm:$0xff]  ;;  %v267_v57 = vunpack.c.l.bf16 %v236_v51  ;;  %v2649_v59 = vld [vmem:[#allocation7 + $0x1a8] sm:$0xff]  ;;  %v824_v0 = vld [vmem:[#allocation2 + $0x2a] sm:$0xff] }
  0x54   : > { %506 = vmatmul.bf16.vlgmr.msra.gmra.mxu2 %v403_v2  ;;  %v2655_v2 = vld [vmem:[#allocation7 + $0x1d8] sm:$0xff] }
  0x55   : > { %v3103_v8 = vld [vmem:[#allocation2 + $0x12] sm:$0xff]  ;;  %v3107_v27 = vld [vmem:[#allocation2 + $0x1a] sm:$0xff] }
  0x56   : > { %623 = vmatpush.bf16.msrb.mxu1 %v2610_v58  ;;  %1055 = vmatpush.bf16.msrb.mxu0 %v2634_v61  ;;  %v830_v10 = vpack.c.bf16 %v3103_v8, %v3101_v7  ;;  %v391_v13 = vld [vmem:[#allocation2 + $0x10] sm:$0xff]  ;;  %v392_v14 = vld [vmem:[#allocation2 + $0x18] sm:$0xff]  ;;  %v831_v33 = vpack.c.bf16 %v3109_v28, %v3107_v27  ;;  %v268_v58 = vunpack.c.h.bf16 %v236_v51 }
  0x57   : > { %767 = vmatpush.bf16.msrb.mxu2 %v2618_v60  ;;  %1487 = vmatpush.bf16.msrb.mxu3 %v2658_v4  ;;  %v400_v20 = vpack.c.bf16 %v392_v14, %v391_v13  ;;  %v965_v43 = vld [vmem:[#allocation2 + $0x13] sm:$0xff]  ;;  %v283_v60 = vmax.f32 %v251_v55, %v267_v57  ;;  %v966_v13 = vld [vmem:[#allocation2 + $0x1b] sm:$0xff]  ;;  %v968_v36 = vld [vmem:[#allocation2 + $0x2b] sm:$0xff] }
  0x58   : > { %918 = vmatmul.bf16.vlgmr.msra.gmra.mxu3 %v830_v10  ;;  %v974_v47 = vpack.c.bf16 %v965_v43, %v3085_v21  ;;  %v284_v61 = vmax.f32 %v252_v56, %v268_v58  ;;  %v2641_v21 = vld [vmem:[#allocation7 + $0x168] sm:$0xff]  ;;  %v2640_v7 = vld [vmem:[#allocation7 + $0x160] sm:$0xff]  ;;  %v976_v40 = vpack.c.bf16 %v3098_v1, %v968_v36  ;;  %v540_v57 = vld [vmem:[#allocation2 + $0x41] sm:$0xff] }
  0x59   : > { %v2661_v43 = vld [vmem:[#allocation7 + $0x208] sm:$0xff]  ;;  %v541_v58 = vld [vmem:[#allocation2 + $0x49] sm:$0xff] }
  0x5a   : > { %624 = vmatpush.bf16.msrb.mxu1 %v2609_v3  ;;  %1056 = vmatpush.bf16.msrb.mxu0 %v2633_v6  ;;  %v395_v15 = vld [vmem:[#allocation2 + $0x30] sm:$0xff]  ;;  %v396_v16 = vld [vmem:[#allocation2 + $0x38] sm:$0xff]  ;;  %v292_v3 = vpack.c.bf16 %v284_v61, %v283_v60 }
  0x5b   : > { %768 = vmatpush.bf16.msrb.mxu2 %v2617_v5  ;;  %v402_v22 = vpack.c.bf16 %v396_v16, %v395_v15  ;;  %1488 = vmatpush.bf16.msrb.mxu3 %v2657_v26  ;;  %v3117_v62 = vld [vmem:[#allocation2 + $0x32] sm:$0xff]  ;;  %v967_v15 = vld [vmem:[#allocation2 + $0x23] sm:$0xff]  ;;  %v826_v26 = vld [vmem:[#allocation2 + $0x3a] sm:$0xff] }
  0x5c   : > { %v832_v4 = vpack.c.bf16 %v3117_v62, %v824_v0  ;;  %v316_v5 = vrot.slane %v292_v3, 4  ;;  %v2648_v6 = vld [vmem:[#allocation7 + $0x1a0] sm:$0xff]  ;;  %v2647_v16 = vld [vmem:[#allocation7 + $0x198] sm:$0xff]  ;;  %v970_v1 = vld [vmem:[#allocation2 + $0x3b] sm:$0xff]  ;;  %v689_v50 = vpack.c.bf16 %v826_v26, %v3117_v62 }
  0x5d   : > { %v1397_v55 = vld [vmem:[#allocation2 + $0x1d] sm:$0xff]  ;;  %v1398_v62 = vld [vmem:[#allocation2 + $0x25] sm:$0xff]  ;;  %v1252_v3 = vld [vmem:[#allocation2 + $0x14] sm:$0xff] }
  0x5e   : > { %625 = vmatpush.bf16.msrb.mxu1 %v2608_v9  ;;  %1057 = vmatpush.bf16.msrb.mxu0 %v2632_v12  ;;  %v2664_v9 = vld [vmem:[#allocation7 + $0x220] sm:$0xff]  ;;  %v332_v10 = vunpack.c.l.bf16 %v316_v5  ;;  %v535_v12 = vld [vmem:[#allocation2 + $0x19] sm:$0xff]  ;;  %v1406_v56 = vpack.c.bf16 %v1397_v55, %v3095_v53 }
  0x5f   : > { %769 = vmatpush.bf16.msrb.mxu2 %v2616_v11  ;;  %1489 = vmatpush.bf16.msrb.mxu3 %v2656_v54  ;;  %v534_v11 = vld [vmem:[#allocation2 + $0x11] sm:$0xff]  ;;  %v1541_v53 = vld [vmem:[#allocation2 + $0x1e] sm:$0xff] }
  0x60   : > { %v340_v14 = vmax.f32 %v283_v60, %v332_v10  ;;  %v2660_v54 = vld [vmem:[#allocation7 + $0x200] sm:$0xff] }
  0x61   : > { %491 = vmatmul.bf16.gmra.mxu0 %v400_v20  ;;  %501 = vmatmul.bf16.gmra.mxu1 %v402_v22  ;;  %v543_v20 = vpack.c.bf16 %v535_v12, %v534_v11  ;;  %v975_v22 = vpack.c.bf16 %v967_v15, %v966_v13  ;;  %v1108_v5 = vld [vmem:[#allocation2 + $0xc] sm:$0xff]  ;;  %v1400_v11 = vld [vmem:[#allocation2 + $0x35] sm:$0xff]  ;;  %v1254_v13 = vld [vmem:[#allocation2 + $0x24] sm:$0xff] }
  0x62   : > { %626 = vmatpush.bf16.msrb.mxu1 %v2607_v17  ;;  %1058 = vmatpush.bf16.msrb.mxu0 %v2631_v19  ;;  %v2639_v17 = vld [vmem:[#allocation7 + $0x158] sm:$0xff]  ;;  %v348_v19 = vpack.c.bf16 %v340_v14, %v340_v14  ;;  %v1408_v12 = vpack.c.bf16 %v3091_v38, %v1400_v11  ;;  %v1256_v38 = vld [vmem:[#allocation2 + $0x34] sm:$0xff] }
  0x63   : > { %770 = vmatpush.bf16.msrb.mxu2 %v2615_v18  ;;  %1490 = vmatpush.bf16.msrb.mxu3 %v2655_v2  ;;  %v687_v18 = vpack.c.bf16 %v3107_v27, %v3103_v8  ;;  %v2645_v8 = vld [vmem:[#allocation7 + $0x188] sm:$0xff]  ;;  %v2662_v27 = vld [vmem:[#allocation7 + $0x210] sm:$0xff]  ;;  %v1255_v14 = vld [vmem:[#allocation2 + $0x2c] sm:$0xff] }
  0x64   : > { %v1542_v15 = vld [vmem:[#allocation2 + $0x26] sm:$0xff] }
  0x66   : > { %627 = vmatpush.bf16.msrb.mxu1 %v2606_v23  ;;  %1059 = vmatpush.bf16.msrb.mxu0 %v2630_v25  ;;  %v356_v23 = vunpack.c.l.bf16 %v348_v19  ;;  %v2663_v25 = vld [vmem:[#allocation7 + $0x218] sm:$0xff] }
  0x67   : > { %771 = vmatpush.bf16.msrb.mxu2 %v2614_v24  ;;  %v2646_v24 = vld [vmem:[#allocation7 + $0x190] sm:$0xff] }
  0x68   : > { %923 = vmatmul.bf16.gmra.mxu3 %v831_v33  ;;  %378 = vst [vmem:[#allocation2 + $0x51] sm:$0xff] %v356_v23  ;;  %v2653_v33 = vld [vmem:[#allocation7 + $0x1c8] sm:$0xff]  ;;  %v1402_v23 = vld [vmem:[#allocation2 + $0x45] sm:$0xff] }
  0x6a   : > { %628 = vmatpush.bf16.msrb.mxu1 %v2605_v29  ;;  %1060 = vmatpush.bf16.msrb.mxu0 %v2629_v32  ;;  %v2654_v29 = vld [vmem:[#allocation7 + $0x1d0] sm:$0xff] }
  0x6b   : > { %772 = vmatpush.bf16.msrb.mxu2 %v2613_v31  ;;  %v2638_v31 = vld [vmem:[#allocation7 + $0x150] sm:$0xff]  ;;  %1491 = vmatpush.bf16.msrb.mxu3 %v2654_v29 }
  0x6c   : > { %v827_v32 = vld [vmem:[#allocation2 + $0x42] sm:$0xff] }
  0x6e   : > { %629 = vmatpush.bf16.msrb.mxu1 %v2604_v34  ;;  %1061 = vmatpush.bf16.msrb.mxu0 %v2628_v37  ;;  %v833_v34 = vpack.c.bf16 %v827_v32, %v826_v26  ;;  %v688_v37 = vpack.c.bf16 %v824_v0, %v3109_v28  ;;  %v538_v28 = vld [vmem:[#allocation2 + $0x31] sm:$0xff] }
  0x6f   : > { %773 = vmatpush.bf16.msrb.mxu2 %v2612_v35  ;;  %1492 = vmatpush.bf16.msrb.mxu3 %v2653_v33  ;;  %v536_v35 = vld [vmem:[#allocation2 + $0x21] sm:$0xff]  ;;  %v973_v60 = vld [vmem:[#allocation2 + $0x53] sm:$0xff] }
  0x71   : > { %630 = vmatmul.bf16.vlgmr.msrb.gmra.mxu1 %v542_v46  ;;  %1062 = vmatmul.bf16.vlgmr.msrb.gmra.mxu0 %v974_v47  ;;  %v829_v46 = vld [vmem:[#allocation2 + $0x52] sm:$0xff] }
  0x72   : > { %1198 = vmatpush.bf16.msra.mxu1 %v2643_v41  ;;  %1630 = vmatpush.bf16.msra.mxu0 %v2667_v44  ;;  %v2637_v41 = vld [vmem:[#allocation7 + $0x148] sm:$0xff]  ;;  %v2652_v44 = vld [vmem:[#allocation7 + $0x1c0] sm:$0xff] }
  0x73   : > { %1342 = vmatpush.bf16.msra.mxu2 %v2651_v39  ;;  %v544_v39 = vpack.c.bf16 %v3088_v30, %v536_v35  ;;  %v2636_v47 = vld [vmem:[#allocation7 + $0x140] sm:$0xff]  ;;  %1493 = vmatpush.bf16.msrb.mxu3 %v2652_v44  ;;  %v539_v30 = vld [vmem:[#allocation2 + $0x39] sm:$0xff] }
  0x74   : > { %774 = vmatmul.bf16.vlgmr.msrb.gmra.mxu2 %v686_v45  ;;  %v828_v45 = vld [vmem:[#allocation2 + $0x4a] sm:$0xff]  ;;  %v545_v51 = vpack.c.bf16 %v539_v30, %v538_v28 }
  0x75   : > { %v690_v61 = vpack.c.bf16 %v828_v45, %v827_v32  ;;  %v1544_v32 = vld [vmem:[#allocation2 + $0x36] sm:$0xff]  ;;  %v1546_v28 = vld [vmem:[#allocation2 + $0x46] sm:$0xff]  ;;  %v1547_v30 = vld [vmem:[#allocation2 + $0x4e] sm:$0xff] }
  0x76   : > { %1199 = vmatpush.bf16.msra.mxu1 %v2642_v49  ;;  %1631 = vmatpush.bf16.msra.mxu0 %v2666_v52  ;;  %v971_v49 = vld [vmem:[#allocation2 + $0x43] sm:$0xff] }
  0x77   : > { %1343 = vmatpush.bf16.msra.mxu2 %v2650_v48  ;;  %v834_v48 = vpack.c.bf16 %v829_v46, %v828_v45  ;;  %v977_v52 = vpack.c.bf16 %v971_v49, %v970_v1  ;;  %v1258_v46 = vld [vmem:[#allocation2 + $0x44] sm:$0xff] }
  0x78   : > { %928 = vmatmul.bf16.gmra.mxu3 %v832_v4  ;;  %v1253_v4 = vld [vmem:[#allocation2 + $0x1c] sm:$0xff] }
  0x7a   : > { %1200 = vmatpush.bf16.msra.mxu1 %v2641_v21  ;;  %1632 = vmatpush.bf16.msra.mxu0 %v2665_v63  ;;  %v546_v21 = vpack.c.bf16 %v541_v58, %v540_v57  ;;  %v1399_v63 = vld [vmem:[#allocation2 + $0x2d] sm:$0xff] }
  0x7b   : > { %1344 = vmatpush.bf16.msra.mxu2 %v2649_v59  ;;  %v972_v59 = vld [vmem:[#allocation2 + $0x4b] sm:$0xff]  ;;  %v1407_v2 = vpack.c.bf16 %v1399_v63, %v1398_v62  ;;  %v1260_v62 = vld [vmem:[#allocation2 + $0x54] sm:$0xff]  ;;  %v1261_v63 = vld [vmem:[#allocation2 + $0x5c] sm:$0xff] }
  0x7c   : > { %v978_v0 = vpack.c.bf16 %v973_v60, %v972_v59 }
  0x7e   : > { %1201 = vmatpush.bf16.msra.mxu1 %v2640_v7  ;;  %1633 = vmatpush.bf16.msra.mxu0 %v2664_v9  ;;  %v1262_v7 = vpack.c.bf16 %v1253_v4, %v1252_v3  ;;  %v1118_v9 = vpack.c.bf16 %v1252_v3, %v1108_v5  ;;  %v1548_v3 = vld [vmem:[#allocation2 + $0x56] sm:$0xff] }
  0x7f   : > { %1345 = vmatpush.bf16.msra.mxu2 %v2648_v6  ;;  %v1540_v6 = vld [vmem:[#allocation2 + $0x16] sm:$0xff] }
  0x80   : > { %v1550_v10 = vpack.c.bf16 %v1541_v53, %v1540_v6  ;;  %v1266_v6 = vpack.c.bf16 %v1261_v63, %v1260_v62 }
  0x81   : > { %635 = vmatmul.bf16.gmra.mxu1 %v543_v20  ;;  %1067 = vmatmul.bf16.gmra.mxu0 %v975_v22 }
  0x82   : > { %1202 = vmatpush.bf16.msra.mxu1 %v2639_v17  ;;  %1634 = vmatpush.bf16.msra.mxu0 %v2663_v25  ;;  %v1263_v17 = vpack.c.bf16 %v1255_v14, %v1254_v13 }
  0x83   : > { %1346 = vmatpush.bf16.msra.mxu2 %v2647_v16  ;;  %v1543_v16 = vld [vmem:[#allocation2 + $0x2e] sm:$0xff] }
  0x84   : > { %779 = vmatmul.bf16.gmra.mxu2 %v687_v18  ;;  %v1119_v18 = vpack.c.bf16 %v1254_v13, %v1253_v4  ;;  %v1551_v19 = vpack.c.bf16 %v1543_v16, %v1542_v15  ;;  %v1549_v4 = vld [vmem:[#allocation2 + $0x5e] sm:$0xff] }
  0x86   : > { %1203 = vmatpush.bf16.msra.mxu1 %v2638_v31  ;;  %1635 = vmatpush.bf16.msra.mxu0 %v2662_v27  ;;  %v1257_v31 = vld [vmem:[#allocation2 + $0x3c] sm:$0xff] }
  0x87   : > { %1347 = vmatpush.bf16.msra.mxu2 %v2646_v24  ;;  %v1403_v24 = vld [vmem:[#allocation2 + $0x4d] sm:$0xff]  ;;  %v1264_v27 = vpack.c.bf16 %v1257_v31, %v1256_v38 }
  0x88   : > { %933 = vmatmul.bf16.gmra.mxu3 %v833_v34  ;;  %v1409_v25 = vpack.c.bf16 %v1403_v24, %v1402_v23  ;;  %v1120_v34 = vpack.c.bf16 %v1256_v38, %v1255_v14  ;;  %v1684_v38 = vlaneseq }
  0x8a   : > { %1204 = vmatpush.bf16.msra.mxu1 %v2637_v41  ;;  %1636 = vmatpush.bf16.msra.mxu0 %v2661_v43  ;;  %v1405_v41 = vld [vmem:[#allocation2 + $0x5d] sm:$0xff] }
  0x8b   : > { %1348 = vmatpush.bf16.msra.mxu2 %v2645_v8  ;;  %v1545_v8 = vld [vmem:[#allocation2 + $0x3e] sm:$0xff] }
  0x8c   : > { %v1552_v35 = vpack.c.bf16 %v1545_v8, %v1544_v32  ;;  %v3148_v8 = vshrl.u32 %v1684_v38, 7 }
  0x8e   : > { %1205 = vmatpush.bf16.msra.mxu1 %v2636_v47  ;;  %1637 = vmatpush.bf16.msra.mxu0 %v2660_v54  ;;  %v1259_v47 = vld [vmem:[#allocation2 + $0x4c] sm:$0xff] }
  0x8f   : > { %1349 = vmatpush.bf16.msra.mxu2 %v2644_v42  ;;  %v1265_v1 = vpack.c.bf16 %v1259_v47, %v1258_v46 }
  0x91   : > { %640 = vmatmul.bf16.gmra.mxu1 %v544_v39  ;;  %1072 = vmatmul.bf16.gmra.mxu0 %v976_v40  ;;  %v1404_v40 = vld [vmem:[#allocation2 + $0x55] sm:$0xff] }
  0x92   : > { %v1410_v43 = vpack.c.bf16 %v1405_v41, %v1404_v40  ;;  %v1699_v40 = vshrl.u32 %v3148_v8, 16 }
  0x94   : > { %784 = vmatmul.bf16.gmra.mxu2 %v688_v37 }
  0x98   : > { %938 = vmatmul.bf16.gmra.mxu3 %v834_v48 }
  0xa1   : > { %645 = vmatmul.bf16.gmra.mxu1 %v545_v51  ;;  %1077 = vmatmul.bf16.gmra.mxu0 %v977_v52  ;;  %v1553_v51 = vpack.c.bf16 %v1547_v30, %v1546_v28 }
  0xa4   : > { %789 = vmatmul.bf16.gmra.mxu2 %v689_v50  ;;  %v1121_v50 = vpack.c.bf16 %v1258_v46, %v1257_v31  ;;  %v1703_v46 = vmul.u32 52429, %v1699_v40 }
  0xa8   : > { %1494 = vmatmul.bf16.vlgmr.msrb.gmra.mxu3 %v1406_v56 }
  0xb1   : > { %650 = vmatmul.bf16.gmra.mxu1 %v546_v21  ;;  %1082 = vmatmul.bf16.gmra.mxu0 %v978_v0 }
  0xb4   : > { %794 = vmatmul.bf16.gmra.mxu2 %v690_v61 }
  0xb8   : > { %1499 = vmatmul.bf16.gmra.mxu3 %v1407_v2 }
  0xc1   : > { %1206 = vmatmul.bf16.vlgmr.msra.gmra.mxu1 %v1118_v9  ;;  %1638 = vmatmul.bf16.vlgmr.msra.gmra.mxu0 %v1550_v10  ;;  %v1122_v9 = vpack.c.bf16 %v1260_v62, %v1259_v47  ;;  %v1554_v10 = vpack.c.bf16 %v1549_v4, %v1548_v3 }
  0xc4   : > { %1350 = vmatmul.bf16.vlgmr.msra.gmra.mxu2 %v1262_v7 }
  0xc8   : > { %1504 = vmatmul.bf16.gmra.mxu3 %v1408_v12 }
  0xce   : > { %v487_v20 = vpop.f32.mrf.mxu0  ;;  %v3128_v22 = vpop.f32.mrf.mxu1 }
  0xd1   : > { %1211 = vmatmul.bf16.gmra.mxu1 %v1119_v18  ;;  %1643 = vmatmul.bf16.gmra.mxu0 %v1551_v19 }
  0xd4   : > { %1355 = vmatmul.bf16.gmra.mxu2 %v1263_v17 }
  0xd6   : > { %v489_v26 = vpop.f32.mrf.mxu0  ;;  %v3130_v29 = vpop.f32.mrf.mxu1 }
  0xd7   : > { %v3134_v39 = vpop.f32.mrf.mxu2 }
  0xd8   : > { %1509 = vmatmul.bf16.gmra.mxu3 %v1409_v25 }
  0xdb   : > { %v919_v33 = vpop.f32.mrf.mxu3 }
  0xde   : > { %v492_v36 = vpop.f32.mrf.mxu0  ;;  %v3132_v37 = vpop.f32.mrf.mxu1 }
  0xdf   : > { %v3138_v48 = vpop.f32.mrf.mxu2 }
  0xe1   : > { %1216 = vmatmul.bf16.gmra.mxu1 %v1120_v34  ;;  %1648 = vmatmul.bf16.gmra.mxu0 %v1552_v35  ;;  %v1698_v35 = vand.u32 65535, %v3148_v8 }
  0xe3   : > { %v921_v42 = vpop.f32.mrf.mxu3  ;;  %v1702_v41 = vmul.u32 52428, %v1698_v35 }
  0xe4   : > { %1360 = vmatmul.bf16.gmra.mxu2 %v1264_v27 }
  0xe5   : > { %v1705_v47 = vshll.u32 %v1702_v41, 16 }
  0xe6   : > { %v494_v44 = vpop.f32.mrf.mxu0  ;;  %v3136_v45 = vpop.f32.mrf.mxu1 }
  0xe8   : > { %1514 = vmatmul.bf16.gmra.mxu3 %v1410_v43 }
  0xeb   : > { %v924_v49 = vpop.f32.mrf.mxu3 }
  0xee   : > { %v631_v52 = vpop.f32.mrf.mxu1  ;;  %v1063_v54 = vpop.f32.mrf.mxu0 }
  0xef   : > { %v656_v55 = vadd.f32 %v631_v52, %v487_v20  ;;  %v3158_v52 = vadd.s32 8, %v3148_v8 }
  0xf1   : > { %1221 = vmatmul.bf16.gmra.mxu1 %v1121_v50  ;;  %1653 = vmatmul.bf16.gmra.mxu0 %v1553_v51 }
  0xf3   : > { %v926_v58 = vpop.f32.mrf.mxu3 }
  0xf4   : > { %1365 = vmatmul.bf16.gmra.mxu2 %v1265_v1  ;;  %v1707_v1 = vshll.u32 %v1703_v46, 16 }
  0xf6   : > { %v633_v60 = vpop.f32.mrf.mxu1  ;;  %v1065_v61 = vpop.f32.mrf.mxu0 }
  0xf7   : > { %v775_v56 = vpop.f32.mrf.mxu2  ;;  %v657_v21 = vadd.f32 %v633_v60, %v489_v26 }
  0xf8   : > { %v800_v57 = vadd.f32 %v775_v56, %v656_v55  ;;  %v2926_v55 = vmov 0  }
  0xfa   : > { %v944_v59 = vadd.f32 %v919_v33, %v800_v57 }
  0xfb   : > { %v929_v53 = vpop.f32.mrf.mxu3 }
  0xfc   : > { %v3140_v0 = vadd.f32 %v1063_v54, %v944_v59  ;;  %v1728_v59 = vshrl.u32 %v3158_v52, 16 }
  0xfe   : > { %v636_v11 = vpop.f32.mrf.mxu1  ;;  %v1068_v12 = vpop.f32.mrf.mxu0  ;;  %v3167_v3 = vmul.u32 52429, %v1728_v59 }
  0xff   : > { %v777_v2 = vpop.f32.mrf.mxu2  ;;  %v658_v13 = vadd.f32 %v636_v11, %v492_v36 }
 0x100   : > { %v801_v5 = vadd.f32 %v777_v2, %v657_v21 }
 0x101   : > { %1226 = vmatmul.bf16.gmra.mxu1 %v1122_v9  ;;  %1658 = vmatmul.bf16.gmra.mxu0 %v1554_v10  ;;  %v1706_v10 = vshrl.u32 %v1702_v41, 16 }
 0x102   : > { %v945_v7 = vadd.f32 %v921_v42, %v801_v5 }
 0x103   : > { %v931_v17 = vpop.f32.mrf.mxu3 }
 0x104   : > { %1370 = vmatmul.bf16.gmra.mxu2 %v1266_v6  ;;  %v3142_v14 = vadd.f32 %v1065_v61, %v945_v7  ;;  %v1736_v6 = vshll.u32 %v3167_v3, 16 }
 0x106   : > { %v638_v19 = vpop.f32.mrf.mxu1  ;;  %v1070_v20 = vpop.f32.mrf.mxu0 }
 0x107   : > { %v780_v15 = vpop.f32.mrf.mxu2  ;;  %v659_v23 = vadd.f32 %v638_v19, %v494_v44  ;;  %v1701_v44 = vmul.u32 52429, %v1698_v35 }
 0x108   : > { %v802_v16 = vadd.f32 %v780_v15, %v658_v13 }
 0x109   : > { %vm1709_vm0 = vc.u32 %v1701_v44, %v1705_v47  ;;  %v1711_v51 = vadd.s32 %v1705_v47, %v1701_v44 }
 0x10a   : > { %v946_v18 = vadd.f32 %v924_v49, %v802_v16  ;;  %v1710_v56 = vsel %vm1709_vm0, 1, %v2926_v55 }
 0x10b   : > { %v3146_v31 = vpop.f32.mrf.mxu3  ;;  %vm1713_vm1 = vc.u32 %v1711_v51, %v1707_v1 }
 0x10c   : > { %v3144_v24 = vadd.f32 %v1068_v12, %v946_v18  ;;  %v1714_v63 = vsel %vm1713_vm1, 1, %v2926_v55 }
 0x10e   : > { %v641_v27 = vpop.f32.mrf.mxu1  ;;  %v1073_v33 = vpop.f32.mrf.mxu0 }
 0x10f   : > { %v782_v25 = vpop.f32.mrf.mxu2  ;;  %v660_v34 = vadd.f32 %v641_v27, %v3128_v22  ;;  %v1704_v22 = vmul.u32 52428, %v1699_v40 }
 0x110   : > { %v803_v26 = vadd.f32 %v782_v25, %v659_v23  ;;  %v1708_v25 = vshrl.u32 %v1703_v46, 16 }
 0x111   : > { %v1712_v61 = vadd.s32 %v1710_v56, %v1704_v22 }
 0x112   : > { %v947_v32 = vadd.f32 %v926_v58, %v803_v26  ;;  %v1727_v58 = vand.u32 65535, %v3158_v52 }
 0x113   : > { %v3155_v28 = vpop.f32.mrf.mxu3  ;;  %v1716_v11 = vadd.s32 %v1714_v63, %v1712_v61  ;;  %v1737_v63 = vshrl.u32 %v3167_v3, 16 }
 0x114   : > { %v3152_v36 = vadd.f32 %v1070_v20, %v947_v32  ;;  %v1731_v21 = vmul.u32 52428, %v1727_v58  ;;  %v1730_v2 = vmul.u32 52429, %v1727_v58 }
 0x115   : > { %v1717_v26 = vadd.s32 %v1716_v11, %v1706_v10 }
 0x116   : > { %v643_v49 = vpop.f32.mrf.mxu1  ;;  %v1075_v50 = vpop.f32.mrf.mxu0 }
 0x117   : > { %v785_v42 = vpop.f32.mrf.mxu2  ;;  %v661_v54 = vadd.f32 %v643_v49, %v3130_v29  ;;  %v1734_v29 = vshll.u32 %v1731_v21, 16  ;;  %v1718_v46 = vadd.s32 %v1717_v26, %v1708_v25 }
 0x118   : > { %v804_v43 = vadd.f32 %v785_v42, %v660_v34  ;;  %v3187_v42 = vadd.s32 24, %v3148_v8 }
 0x119   : > { %vm1738_vm2 = vc.u32 %v1730_v2, %v1734_v29  ;;  %v1740_v12 = vadd.s32 %v1734_v29, %v1730_v2  ;;  %v1719_v61 = vshrl.u32 %v1718_v46, 3 }
 0x11a   : > { %v948_v30 = vadd.f32 %v929_v53, %v804_v43  ;;  %v3173_v53 = vadd.s32 16, %v3148_v8  ;;  %v1739_v18 = vsel %vm1738_vm2, 1, %v2926_v55  ;;  %v1785_v49 = vand.u32 65535, %v3187_v42 }
 0x11b   : > { %v3169_v5 = vpop.f32.mrf.mxu3  ;;  %vm1742_vm3 = vc.u32 %v1740_v12, %v1736_v6 }
 0x11c   : > { %v3162_v57 = vadd.f32 %v1073_v33, %v948_v30  ;;  %v1756_v15 = vand.u32 65535, %v3173_v53  ;;  %v1757_v19 = vshrl.u32 %v3173_v53, 16 }
 0x11e   : > { %v646_v7 = vpop.f32.mrf.mxu1  ;;  %v1078_v9 = vpop.f32.mrf.mxu0  ;;  %v1760_v20 = vmul.u32 52428, %v1756_v15  ;;  %v1759_v32 = vmul.u32 52429, %v1756_v15  ;;  %v3181_v27 = vmul.u32 52429, %v1757_v19  ;;  %v1762_v40 = vmul.u32 52428, %v1757_v19 }
 0x11f   : > { %v787_v60 = vpop.f32.mrf.mxu2  ;;  %v662_v13 = vadd.f32 %v646_v7, %v3132_v37  ;;  %v1743_v37 = vsel %vm1742_vm3, 1, %v2926_v55 }
 0x120   : > { %v805_v62 = vadd.f32 %v787_v60, %v661_v54  ;;  %v1763_v34 = vshll.u32 %v1760_v20, 16  ;;  %v1765_v41 = vshll.u32 %v3181_v27, 16  ;;  %v1764_v6 = vshrl.u32 %v1760_v20, 16 }
 0x121   : > { %v1766_v25 = vshrl.u32 %v3181_v27, 16 }
 0x122   : > { %v949_v4 = vadd.f32 %v931_v17, %v805_v62  ;;  %v1733_v17 = vmul.u32 52428, %v1728_v59  ;;  %vm1767_vm4 = vc.u32 %v1759_v32, %v1763_v34  ;;  %v1769_v1 = vadd.s32 %v1763_v34, %v1759_v32 }
 0x123   : > { %v3190_v30 = vpop.f32.mrf.mxu3  ;;  %v1786_v59 = vshrl.u32 %v3187_v42, 16  ;;  %v1788_v62 = vmul.u32 52429, %v1785_v49 }
 0x124   : > { %v3177_v16 = vadd.f32 %v1075_v50, %v949_v4  ;;  %v1741_v33 = vadd.s32 %v1739_v18, %v1733_v17  ;;  %v1735_v50 = vshrl.u32 %v1731_v21, 16  ;;  %vm1771_vm5 = vc.u32 %v1769_v1, %v1765_v41 }
 0x125   : > { %v1772_v58 = vsel %vm1771_vm5, 1, %v2926_v55  ;;  %v3199_v21 = vmul.u32 52429, %v1786_v59  ;;  %v1791_v12 = vmul.u32 52428, %v1786_v59  ;;  %v1720_v17 = vmul.u32 10, %v1719_v61 }
 0x126   : > { %v648_v43 = vpop.f32.mrf.mxu1  ;;  %v1080_v44 = vpop.f32.mrf.mxu0  ;;  %v1745_v22 = vadd.s32 %v1743_v37, %v1741_v33  ;;  %v3226_v1 = vadd.s32 40, %v3148_v8 }
 0x127   : > { %v790_v23 = vpop.f32.mrf.mxu2  ;;  %v663_v47 = vadd.f32 %v648_v43, %v3136_v45  ;;  %v1789_v45 = vmul.u32 52428, %v1785_v49  ;;  %v3218_v34 = vsub.s32 %v3148_v8, %v1720_v17 }
 0x128   : > { %v806_v38 = vadd.f32 %v790_v23, %v662_v13  ;;  %v1746_v2 = vadd.s32 %v1745_v22, %v1735_v50  ;;  %v1794_v13 = vshll.u32 %v3199_v21, 16 }
 0x129   : > { %v1792_v29 = vshll.u32 %v1789_v45, 16  ;;  %vm1985_vm9 = vcmp.ne.s32.totalorder %v3218_v34, 0  ;;  %vm1995_vm10 = vcmp.lt.s32.totalorder %v3218_v34, 0 }
 0x12a   : > { %v950_v35 = vadd.f32 %v3146_v31, %v806_v38  ;;  %v1768_v31 = vsel %vm1767_vm4, 1, %v2926_v55  ;;  %v1747_v18 = vadd.s32 %v1746_v2, %v1737_v63  ;;  %v1844_v2 = vshrl.u32 %v3226_v1, 16  ;;  %vm3252_vm12 = vmand %vm1995_vm10, %vm1985_vm9 }
 0x12b   : > { %v1770_v54 = vadd.s32 %v1768_v31, %v1762_v40  ;;  %vm1796_vm6 = vc.u32 %v1788_v62, %v1792_v29  ;;  %v1798_v3 = vadd.s32 %v1792_v29, %v1788_v62  ;;  %v3211_v23 = vpop.f32.mrf.mxu3  ;;  %v1795_v62 = vshrl.u32 %v3199_v21, 16 }
 0x12c   : > { %v3194_v51 = vadd.f32 %v1078_v9, %v950_v35  ;;  %v3203_v9 = vadd.s32 32, %v3148_v8  ;;  %v1797_v19 = vsel %vm1796_vm6, 1, %v2926_v55  ;;  %v1748_v40 = vshrl.u32 %v1747_v18, 3 }
 0x12d   : > { %v1774_v7 = vadd.s32 %v1772_v58, %v1770_v54  ;;  %v1799_v32 = vadd.s32 %v1797_v19, %v1791_v12  ;;  %vm1800_vm7 = vc.u32 %v1798_v3, %v1794_v13  ;;  %v3242_v13 = vmul.u32 52429, %v1844_v2 }
 0x12e   : > { %v651_v10 = vpop.f32.mrf.mxu1  ;;  %v1083_v11 = vpop.f32.mrf.mxu0  ;;  %v1801_v35 = vsel %vm1800_vm7, 1, %v2926_v55 }
 0x12f   : > { %v792_v56 = vpop.f32.mrf.mxu2  ;;  %v664_v15 = vadd.f32 %v651_v10, %v3134_v39  ;;  %v1775_v26 = vadd.s32 %v1774_v7, %v1764_v6  ;;  %v1815_v39 = vshrl.u32 %v3203_v9, 16  ;;  %v1803_v22 = vadd.s32 %v1801_v35, %v1799_v32 }
 0x130   : > { %v807_v60 = vadd.f32 %v792_v56, %v663_v47  ;;  %v1793_v47 = vshrl.u32 %v1789_v45, 16  ;;  %v1749_v45 = vmul.u32 10, %v1748_v40  ;;  %v1849_v35 = vmul.u32 52428, %v1844_v2 }
 0x131   : > { %v3221_v43 = vmul.u32 52429, %v1815_v39  ;;  %v1776_v46 = vadd.s32 %v1775_v26, %v1766_v25  ;;  %v1820_v58 = vmul.u32 52428, %v1815_v39 }
 0x132   : > { %v951_v4 = vadd.f32 %v3155_v28, %v807_v60  ;;  %v1814_v28 = vand.u32 65535, %v3203_v9  ;;  %v1804_v63 = vadd.s32 %v1803_v22, %v1793_v47  ;;  %v3257_v18 = vsub.s32 %v3158_v52, %v1749_v45 }
 0x133   : > { %v1823_v31 = vshll.u32 %v3221_v43, 16  ;;  %v1777_v60 = vshrl.u32 %v1776_v46, 3  ;;  %v3239_v6 = vpop.f32.mrf.mxu3 }
 0x134   : > { %v3209_v20 = vadd.f32 %v1080_v44, %v951_v4  ;;  %v3215_v33 = vmul.u32 52428, %v1814_v28  ;;  %v1817_v41 = vmul.u32 52429, %v1814_v28  ;;  %v2015_v4 = vadd.s32 10, %v3218_v34 }
 0x135   : > { %v1778_v19 = vmul.u32 10, %v1777_v60  ;;  %v1805_v26 = vadd.s32 %v1804_v63, %v1795_v62  ;;  %vm1986_vm14 = vcmp.ne.s32.totalorder %v3257_v18, 0  ;;  %vm1996_vm0 = vcmp.lt.s32.totalorder %v3257_v18, 0 }
 0x136   : > { %v1821_v27 = vshll.u32 %v3215_v33, 16  ;;  %v653_v49 = vpop.f32.mrf.mxu1  ;;  %v1085_v50 = vpop.f32.mrf.mxu0  ;;  %v1822_v32 = vshrl.u32 %v3215_v33, 16  ;;  %v2025_v52 = vsel %vm3252_vm12, %v2015_v4, %v3218_v34  ;;  %vm3307_vm4 = vmand %vm1996_vm0, %vm1986_vm14 }
 0x137   : > { %v795_v38 = vpop.f32.mrf.mxu2  ;;  %v665_v56 = vadd.f32 %v653_v49, %v3138_v48  ;;  %v3270_v40 = vsub.s32 %v3173_v53, %v1778_v19  ;;  %v1806_v33 = vshrl.u32 %v1805_v26, 3  ;;  %v1824_v53 = vshrl.u32 %v3221_v43, 16 }
 0x138   : > { %v808_v37 = vadd.f32 %v795_v38, %v664_v15  ;;  %vm1825_vm8 = vc.u32 %v1817_v41, %v1821_v27  ;;  %v1827_v54 = vadd.s32 %v1821_v27, %v1817_v41  ;;  %vm3289_vm1 = vcmp.lt.s32.totalorder %v2025_v52, 8 }
 0x139   : > { %v1826_v59 = vsel %vm1825_vm8, 1, %v2926_v55  ;;  %vm1987_vm2 = vcmp.ne.s32.totalorder %v3270_v40, 0  ;;  %vm1997_vm3 = vcmp.lt.s32.totalorder %v3270_v40, 0 }
 0x13a   : > { %v952_v44 = vadd.f32 %v3169_v5, %v808_v37  ;;  %v1843_v5 = vand.u32 65535, %v3226_v1  ;;  %vm1829_vm11 = vc.u32 %v1827_v54, %v1823_v31  ;;  %v1828_v7 = vadd.s32 %v1826_v59, %v1820_v58  ;;  %vm3331_vm6 = vmand %vm1997_vm3, %vm1987_vm2 }
 0x13b   : > { %v1830_v12 = vsel %vm1829_vm11, 1, %v2926_v55  ;;  %v3263_v37 = vadd.s32 48, %v3148_v8 }
 0x13c   : > { %v3236_v29 = vmul.u32 52428, %v1843_v5  ;;  %v1846_v10 = vmul.u32 52429, %v1843_v5  ;;  %v3245_v17 = vadd.f32 %v1083_v11, %v952_v44  ;;  %v1852_v11 = vshll.u32 %v3242_v13, 16  ;;  %v3294_v5 = vpop.f32.mrf.mxu3 }
 0x13d   : > { %v1832_v39 = vadd.s32 %v1830_v12, %v1828_v7  ;;  %v1873_v46 = vshrl.u32 %v3263_v37, 16 }
 0x13e   : > { %v1850_v15 = vshll.u32 %v3236_v29, 16  ;;  %v1207_v28 = vpop.f32.mrf.mxu1  ;;  %v1639_v25 = vpop.f32.mrf.mxu0  ;;  %v1851_v7 = vshrl.u32 %v3236_v29, 16  ;;  %v2017_v29 = vadd.s32 10, %v3270_v40 }
 0x13f   : > { %v797_v61 = vpop.f32.mrf.mxu2  ;;  %v1833_v49 = vadd.s32 %v1832_v39, %v1822_v32  ;;  %v1878_v19 = vmul.u32 52428, %v1873_v46 }
 0x140   : > { %v809_v48 = vadd.f32 %v797_v61, %v665_v56  ;;  %vm1854_vm13 = vc.u32 %v1846_v10, %v1850_v15  ;;  %v1856_v38 = vadd.s32 %v1850_v15, %v1846_v10  ;;  %v3286_v56 = vmul.u32 52429, %v1873_v46 }
 0x141   : > { %v1855_v41 = vsel %vm1854_vm13, 1, %v2926_v55 }
 0x142   : > { %v953_v21 = vadd.f32 %v3190_v30, %v809_v48  ;;  %v1232_v30 = vadd.f32 %v1207_v28, %v3140_v0  ;;  %v1872_v0 = vand.u32 65535, %v3263_v37  ;;  %vm3274_vm15 = vc.u32 %v1856_v38, %v1852_v11 }
 0x143   : > { %v1857_v22 = vadd.s32 %v1855_v41, %v1849_v35  ;;  %v1859_v43 = vsel %vm3274_vm15, 1, %v2926_v55  ;;  %v1834_v48 = vadd.s32 %v1833_v49, %v1824_v53  ;;  %v1881_v4 = vshll.u32 %v3286_v56, 16 }
 0x144   : > { %v3279_v47 = vadd.f32 %v1085_v50, %v953_v21  ;;  %v1875_v31 = vmul.u32 52429, %v1872_v0  ;;  %v3284_v54 = vmul.u32 52428, %v1872_v0  ;;  %v2016_v50 = vadd.s32 10, %v3257_v18  ;;  %v1502_v53 = vpop.f32.mrf.mxu3 }
 0x145   : > { %v1861_v10 = vadd.s32 %v1859_v43, %v1857_v22  ;;  %v1835_v38 = vshrl.u32 %v1834_v48, 3  ;;  %v2027_v0 = vsel %vm3331_vm6, %v2017_v29, %v3270_v40 }
 0x146   : > { %v1209_v45 = vpop.f32.mrf.mxu1  ;;  %v1641_v60 = vpop.f32.mrf.mxu0  ;;  %v1879_v61 = vshll.u32 %v3284_v54, 16  ;;  %v2026_v3 = vsel %vm3307_vm4, %v2016_v50, %v3257_v18  ;;  %v1853_v18 = vshrl.u32 %v3242_v13, 16  ;;  %vm3364_vm11 = vcmp.lt.s32.totalorder %v2027_v0, 8 }
 0x147   : > { %v1351_v27 = vpop.f32.mrf.mxu2  ;;  %v1233_v63 = vadd.f32 %v1209_v45, %v3142_v14  ;;  %v3316_v14 = vadd.s32 56, %v3148_v8  ;;  %vm3342_vm8 = vcmp.lt.s32.totalorder %v2026_v3, 8  ;;  %v1836_v49 = vmul.u32 10, %v1835_v38 }
 0x148   : > { %v1376_v34 = vadd.f32 %v1351_v27, %v1232_v30  ;;  %vm1883_vm5 = vc.u32 %v1875_v31, %v1879_v61  ;;  %v1885_v12 = vadd.s32 %v1879_v61, %v1875_v31  ;;  %v1862_v30 = vadd.s32 %v1861_v10, %v1851_v7 }
 0x149   : > { %v1884_v11 = vsel %vm1883_vm5, 1, %v2926_v55  ;;  %v1901_v32 = vand.u32 65535, %v3316_v14  ;;  %v1902_v35 = vshrl.u32 %v3316_v14, 16  ;;  %v3379_v7 = vsub.s32 %v3203_v9, %v1836_v49 }
 0x14a   : > { %v1520_v58 = vadd.f32 %v3211_v23, %v1376_v34  ;;  %v1807_v23 = vmul.u32 10, %v1806_v33  ;;  %vm1887_vm7 = vc.u32 %v1885_v12, %v1881_v4  ;;  %v1886_v27 = vadd.s32 %v1884_v11, %v1878_v19 }
 0x14b   : > { %v1888_v13 = vsel %vm1887_vm7, 1, %v2926_v55  ;;  %v3351_v33 = vmul.u32 52428, %v1901_v32  ;;  %v1904_v46 = vmul.u32 52429, %v1901_v32  ;;  %v3354_v34 = vmul.u32 52429, %v1902_v35 }
 0x14c   : > { %v1664_v62 = vadd.f32 %v1639_v25, %v1520_v58  ;;  %v3336_v26 = vsub.s32 %v3187_v42, %v1807_v23  ;;  %v1863_v22 = vadd.s32 %v1862_v30, %v1853_v18  ;;  %v1880_v58 = vshrl.u32 %v3284_v54, 16 }
 0x14d   : > { %v1908_v59 = vshll.u32 %v3351_v33, 16  ;;  %v1890_v45 = vadd.s32 %v1888_v13, %v1886_v27  ;;  %v1907_v2 = vmul.u32 52428, %v1902_v35  ;;  %v3383_v12 = vadd.s32 64, %v3148_v8 }
 0x14e   : > { %v2075_v15 = vsel %vm3289_vm1, %v1664_v62, 0.0  ;;  %v1212_v41 = vpop.f32.mrf.mxu1  ;;  %v1644_v42 = vpop.f32.mrf.mxu0  ;;  %vm1988_vm9 = vcmp.ne.s32.totalorder %v3336_v26, 0  ;;  %vm1998_vm10 = vcmp.lt.s32.totalorder %v3336_v26, 0  ;;  %v1882_v3 = vshrl.u32 %v3286_v56, 16 }
 0x14f   : > { %2085 = vst [vmem:[%s3320_s23] sm:$0xff] %v2075_v15  ;;  %v1353_v21 = vpop.f32.mrf.mxu2  ;;  %v2110_v40 = vmul.f32 %v2075_v15, %v2075_v15  ;;  %vm1912_vm12 = vc.u32 %v1904_v46, %v1908_v59  ;;  %v1914_v54 = vadd.s32 %v1908_v59, %v1904_v46  ;;  %vm3374_vm13 = vmand %vm1998_vm10, %vm1988_vm9  ;;  %v1891_v29 = vadd.s32 %v1890_v45, %v1880_v58 }
 0x150   : > { %v1377_v28 = vadd.f32 %v1353_v21, %v1233_v63  ;;  %v2018_v63 = vadd.s32 10, %v3336_v26  ;;  %v1913_v10 = vsel %vm1912_vm12, 1, %v2926_v55  ;;  %v1930_v11 = vand.u32 65535, %v3383_v12 }
 0x151   : > { %v1915_v25 = vadd.s32 %v1913_v10, %v1907_v2  ;;  %v1931_v38 = vshrl.u32 %v3383_v12, 16  ;;  %vm1989_vm15 = vcmp.ne.s32.totalorder %v3379_v7, 0  ;;  %vm1999_vm0 = vcmp.lt.s32.totalorder %v3379_v7, 0 }
 0x152   : > { %v1521_v39 = vadd.f32 %v3239_v6, %v1377_v28  ;;  %v1234_v6 = vadd.f32 %v1212_v41, %v3144_v24  ;;  %v2028_v9 = vsel %vm3374_vm13, %v2018_v63, %v3336_v26  ;;  %v1892_v52 = vadd.s32 %v1891_v29, %v1882_v3  ;;  %vm3417_vm2 = vmand %vm1999_vm0, %vm1989_vm15 }
 0x153   : > { %v1933_v41 = vmul.u32 52429, %v1930_v11  ;;  %v3400_v0 = vmul.u32 52429, %v1931_v38  ;;  %v1909_v13 = vshrl.u32 %v3351_v33, 16  ;;  %vm2038_vm1 = vcmp.lt.s32.totalorder %v2028_v9, 8 }
 0x154   : > { %v1665_v44 = vadd.f32 %v1641_v60, %v1521_v39  ;;  %v1910_v60 = vshll.u32 %v3354_v34, 16  ;;  %v1505_v39 = vpop.f32.mrf.mxu3  ;;  %v2019_v59 = vadd.s32 10, %v3379_v7  ;;  %v1893_v33 = vshrl.u32 %v1892_v52, 3 }
 0x155   : > { %v1911_v45 = vshrl.u32 %v3354_v34, 16 }
 0x156   : > { %v2076_v31 = vsel %vm3342_vm8, %v1665_v44, 0.0  ;;  %v1646_v21 = vpop.f32.mrf.mxu0  ;;  %vm1916_vm14 = vc.u32 %v1914_v54, %v1910_v60  ;;  %v1894_v10 = vmul.u32 10, %v1893_v33 }
 0x157   : > { %2086 = vst [vmem:[%s3320_s23 + $0x8] sm:$0xff] %v2076_v31  ;;  %v2095_v24 = vadd.f32 %v2076_v31, %v2075_v15  ;;  %v2111_v50 = vmul.f32 %v2076_v31, %v2076_v31  ;;  %v1356_v43 = vpop.f32.mrf.mxu2  ;;  %v1214_v15 = vpop.f32.mrf.mxu1  ;;  %v1917_v56 = vsel %vm1916_vm14, 1, %v2926_v55 }
 0x158   : > { %v1378_v23 = vadd.f32 %v1356_v43, %v1234_v6  ;;  %v1235_v28 = vadd.f32 %v1214_v15, %v3152_v36  ;;  %v1919_v44 = vadd.s32 %v1917_v56, %v1915_v25  ;;  %v1936_v6 = vmul.u32 52428, %v1931_v38 }
 0x159   : > { %v2120_v62 = vadd.f32 %v2111_v50, %v2110_v40  ;;  %v3406_v40 = vadd.s32 72, %v3148_v8 }
 0x15a   : > { %v1522_v48 = vadd.f32 %v3294_v5, %v1378_v23  ;;  %v1864_v5 = vshrl.u32 %v1863_v22, 3  ;;  %v1939_v22 = vshll.u32 %v3400_v0, 16  ;;  %v1920_v60 = vadd.s32 %v1919_v44, %v1909_v13 }
 0x15b   : > { %v1959_v23 = vand.u32 65535, %v3406_v40 }
 0x15c   : > { %v1666_v19 = vadd.f32 %v1644_v42, %v1522_v48  ;;  %v1865_v26 = vmul.u32 10, %v1864_v5  ;;  %v3398_v42 = vmul.u32 52428, %v1930_v11  ;;  %v2029_v48 = vsel %vm3417_vm2, %v2019_v59, %v3379_v7  ;;  %v1507_v5 = vpop.f32.mrf.mxu3 }
 0x15d   : > { %v1963_v15 = vmul.u32 52428, %v1959_v23  ;;  %v1921_v3 = vadd.s32 %v1920_v60, %v1911_v45  ;;  %v1962_v29 = vmul.u32 52429, %v1959_v23  ;;  %vm2039_vm7 = vcmp.lt.s32.totalorder %v2029_v48, 8 }
 0x15e   : > { %v2077_v18 = vsel %vm3364_vm11, %v1666_v19, 0.0  ;;  %v1937_v49 = vshll.u32 %v3398_v42, 16  ;;  %v1649_v58 = vpop.f32.mrf.mxu0 }
 0x15f   : > { %2087 = vst [vmem:[%s3320_s23 + $0x10] sm:$0xff] %v2077_v18  ;;  %v2096_v36 = vadd.f32 %v2095_v24, %v2077_v18  ;;  %v2112_v30 = vmul.f32 %v2077_v18, %v2077_v18  ;;  %v1358_v32 = vpop.f32.mrf.mxu2  ;;  %v1217_v31 = vpop.f32.mrf.mxu1  ;;  %v3410_v24 = vsub.s32 %v3226_v1, %v1865_v26  ;;  %v1966_v18 = vshll.u32 %v1963_v15, 16 }
 0x160   : > { %v1379_v35 = vadd.f32 %v1358_v32, %v1235_v28  ;;  %vm1941_vm3 = vc.u32 %v1933_v41, %v1937_v49  ;;  %v1943_v43 = vadd.s32 %v1937_v49, %v1933_v41  ;;  %v1938_v28 = vshrl.u32 %v3398_v42, 16 }
 0x161   : > { %v2121_v27 = vadd.f32 %v2120_v62, %v2112_v30  ;;  %v1942_v1 = vsel %vm1941_vm3, 1, %v2926_v55  ;;  %vm1990_vm5 = vcmp.ne.s32.totalorder %v3410_v24, 0  ;;  %vm2000_vm6 = vcmp.lt.s32.totalorder %v3410_v24, 0 }
 0x162   : > { %v1523_v46 = vadd.f32 %v1502_v53, %v1379_v35  ;;  %v1236_v53 = vadd.f32 %v1217_v31, %v3162_v57  ;;  %v1944_v62 = vadd.s32 %v1942_v1, %v1936_v6  ;;  %vm1945_vm4 = vc.u32 %v1943_v43, %v1939_v22  ;;  %vm3440_vm8 = vmand %vm2000_vm6, %vm1990_vm5 }
 0x163   : > { %v1960_v57 = vshrl.u32 %v3406_v40, 16  ;;  %v1946_v34 = vsel %vm1945_vm4, 1, %v2926_v55  ;;  %v2020_v30 = vadd.s32 10, %v3410_v24  ;;  %v1895_v32 = vsub.s32 %v3263_v37, %v1894_v10 }
 0x164   : > { %v1667_v50 = vadd.f32 %v1646_v21, %v1523_v46  ;;  %v1948_v9 = vadd.s32 %v1946_v34, %v1944_v62  ;;  %v1922_v26 = vshrl.u32 %v1921_v3, 3  ;;  %vm1970_vm9 = vc.u32 %v1962_v29, %v1966_v18 }
 0x165   : > { %v1964_v25 = vmul.u32 52429, %v1960_v57  ;;  %v1965_v38 = vmul.u32 52428, %v1960_v57  ;;  %v1972_v35 = vadd.s32 %v1966_v18, %v1962_v29  ;;  %v1940_v42 = vshrl.u32 %v3400_v0, 16 }
 0x166   : > { %v2078_v61 = vsel %vm2038_vm1, %v1667_v50, 0.0  ;;  %v1651_v11 = vpop.f32.mrf.mxu0  ;;  %v2030_v49 = vsel %vm3440_vm8, %v2020_v30, %v3410_v24  ;;  %vm1991_vm11 = vcmp.ne.s32.totalorder %v1895_v32, 0  ;;  %vm2001_vm12 = vcmp.lt.s32.totalorder %v1895_v32, 0 }
 0x167   : > { %2088 = vst [vmem:[%s3320_s23 + $0x18] sm:$0xff] %v2078_v61  ;;  %v2097_v63 = vadd.f32 %v2096_v36, %v2078_v61  ;;  %v2113_v2 = vmul.f32 %v2078_v61, %v2078_v61  ;;  %v1361_v54 = vpop.f32.mrf.mxu2  ;;  %v1219_v7 = vpop.f32.mrf.mxu1  ;;  %v1968_v52 = vshll.u32 %v1964_v25, 16  ;;  %v1923_v0 = vmul.u32 10, %v1922_v26  ;;  %vm3452_vm14 = vmand %vm2001_vm12, %vm1991_vm11 }
 0x168   : > { %v1380_v4 = vadd.f32 %v1361_v54, %v1236_v53  ;;  %v1237_v36 = vadd.f32 %v1219_v7, %v3177_v16  ;;  %v1949_v16 = vadd.s32 %v1948_v9, %v1938_v28  ;;  %v1967_v33 = vshrl.u32 %v1963_v15, 16  ;;  %v1510_v53 = vpop.f32.mrf.mxu3 }
 0x169   : > { %v2122_v21 = vadd.f32 %v2121_v27, %v2113_v2  ;;  %v1971_v27 = vsel %vm1970_vm9, 1, %v2926_v55  ;;  %vm1974_vm10 = vc.u32 %v1972_v35, %v1968_v52  ;;  %vm2040_vm13 = vcmp.lt.s32.totalorder %v2030_v49, 8 }
 0x16a   : > { %v1524_v19 = vadd.f32 %v1505_v39, %v1380_v4  ;;  %v1973_v6 = vadd.s32 %v1971_v27, %v1965_v38  ;;  %v1975_v22 = vsel %vm1974_vm10, 1, %v2926_v55  ;;  %v1950_v59 = vadd.s32 %v1949_v16, %v1940_v42 }
 0x16b   : > { %v2021_v60 = vadd.s32 10, %v1895_v32  ;;  %v1924_v55 = vsub.s32 %v3316_v14, %v1923_v0  ;;  %v1969_v62 = vshrl.u32 %v1964_v25, 16 }
 0x16c   : > { %v1668_v56 = vadd.f32 %v1649_v58, %v1524_v19  ;;  %v1977_v50 = vadd.s32 %v1975_v22, %v1973_v6  ;;  %v1951_v61 = vshrl.u32 %v1950_v59, 3 }
 0x16d   : > { %vm1992_vm15 = vcmp.ne.s32.totalorder %v1924_v55, 0  ;;  %vm2002_vm0 = vcmp.lt.s32.totalorder %v1924_v55, 0  ;;  %v2022_v3 = vadd.s32 10, %v1924_v55 }
 0x16e   : > { %v2079_v41 = vsel %vm2039_vm7, %v1668_v56, 0.0  ;;  %v1654_v1 = vpop.f32.mrf.mxu0  ;;  %v1978_v57 = vadd.s32 %v1977_v50, %v1967_v33  ;;  %v1952_v10 = vmul.u32 10, %v1951_v61  ;;  %vm3461_vm2 = vmand %vm2002_vm0, %vm1992_vm15 }
 0x16f   : > { %2089 = vst [vmem:[%s3320_s23 + $0x20] sm:$0xff] %v2079_v41  ;;  %v2098_v37 = vadd.f32 %v2097_v63, %v2079_v41  ;;  %v2114_v13 = vmul.f32 %v2079_v41, %v2079_v41  ;;  %v1363_v44 = vpop.f32.mrf.mxu2  ;;  %v1222_v8 = vpop.f32.mrf.mxu1 }
 0x170   : > { %v1381_v46 = vadd.f32 %v1363_v44, %v1237_v36  ;;  %v1238_v45 = vadd.f32 %v1222_v8, %v3194_v51  ;;  %v2031_v51 = vsel %vm3452_vm14, %v2021_v60, %v1895_v32  ;;  %v1979_v15 = vadd.s32 %v1978_v57, %v1969_v62  ;;  %v1512_v29 = vpop.f32.mrf.mxu3 }
 0x171   : > { %v2123_v31 = vadd.f32 %v2122_v21, %v2114_v13  ;;  %vm2041_vm1 = vcmp.lt.s32.totalorder %v2031_v51, 8  ;;  %v1953_v9 = vsub.s32 %v3383_v12, %v1952_v10 }
 0x172   : > { %v1525_v58 = vadd.f32 %v1507_v5, %v1381_v46  ;;  %v1980_v25 = vshrl.u32 %v1979_v15, 3 }
 0x173   : > { %vm1993_vm3 = vcmp.ne.s32.totalorder %v1953_v9, 0  ;;  %vm2003_vm4 = vcmp.lt.s32.totalorder %v1953_v9, 0  ;;  %v2023_v52 = vadd.s32 10, %v1953_v9 }
 0x174   : > { %v1669_v43 = vadd.f32 %v1651_v11, %v1525_v58  ;;  %v1981_v32 = vmul.u32 10, %v1980_v25  ;;  %vm2013_vm6 = vmand %vm2003_vm4, %vm1993_vm3 }
 0x175   : > { %v2033_v44 = vsel %vm2013_vm6, %v2023_v52, %v1953_v9 }
 0x176   : > { %v2080_v23 = vsel %vm2040_vm13, %v1669_v43, 0.0  ;;  %v1656_v38 = vpop.f32.mrf.mxu0  ;;  %v1982_v41 = vsub.s32 %v3406_v40, %v1981_v32  ;;  %vm2043_vm9 = vcmp.lt.s32.totalorder %v2033_v44, 8 }
 0x177   : > { %2090 = vst [vmem:[%s3320_s23 + $0x28] sm:$0xff] %v2080_v23  ;;  %v2099_v63 = vadd.f32 %v2098_v37, %v2080_v23  ;;  %v2115_v2 = vmul.f32 %v2080_v23, %v2080_v23  ;;  %v1366_v54 = vpop.f32.mrf.mxu2  ;;  %v1224_v14 = vpop.f32.mrf.mxu1 }
 0x178   : > { %v1382_v48 = vadd.f32 %v1366_v54, %v1238_v45  ;;  %v1239_v5 = vadd.f32 %v1224_v14, %v3209_v20  ;;  %v2032_v20 = vsel %vm3461_vm2, %v2022_v3, %v1924_v55  ;;  %v1515_v27 = vpop.f32.mrf.mxu3  ;;  %vm1994_vm7 = vcmp.ne.s32.totalorder %v1982_v41, 0 }
 0x179   : > { %v2124_v34 = vadd.f32 %v2123_v31, %v2115_v2  ;;  %vm2042_vm5 = vcmp.lt.s32.totalorder %v2032_v20, 8  ;;  %vm2004_vm8 = vcmp.lt.s32.totalorder %v1982_v41, 0  ;;  %v2024_v31 = vadd.s32 10, %v1982_v41 }
 0x17a   : > { %v1526_v4 = vadd.f32 %v1510_v53, %v1382_v48  ;;  %vm2014_vm10 = vmand %vm2004_vm8, %vm1994_vm7 }
 0x17b   : > { %v2034_v53 = vsel %vm2014_vm10, %v2024_v31, %v1982_v41 }
 0x17c   : > { %v1670_v21 = vadd.f32 %v1654_v1, %v1526_v4  ;;  %vm2044_vm11 = vcmp.lt.s32.totalorder %v2034_v53, 8 }
 0x17e   : > { %v2081_v28 = vsel %vm2041_vm1, %v1670_v21, 0.0  ;;  %v1659_v46 = vpop.f32.mrf.mxu0 }
 0x17f   : > { %2091 = vst [vmem:[%s3320_s23 + $0x30] sm:$0xff] %v2081_v28  ;;  %v2100_v7 = vadd.f32 %v2099_v63, %v2081_v28  ;;  %v2116_v11 = vmul.f32 %v2081_v28, %v2081_v28  ;;  %v1368_v18 = vpop.f32.mrf.mxu2  ;;  %v1227_v39 = vpop.f32.mrf.mxu1 }
 0x180   : > { %v1383_v56 = vadd.f32 %v1368_v18, %v1239_v5  ;;  %v1240_v12 = vadd.f32 %v1227_v39, %v3245_v17  ;;  %v1517_v43 = vpop.f32.mrf.mxu3 }
 0x181   : > { %v2125_v36 = vadd.f32 %v2124_v34, %v2116_v11 }
 0x182   : > { %v1527_v30 = vadd.f32 %v1512_v29, %v1383_v56 }
 0x184   : > { %v1671_v26 = vadd.f32 %v1656_v38, %v1527_v30 }
 0x186   : > { %v2082_v35 = vsel %vm2042_vm5, %v1671_v26, 0.0 }
 0x187   : > { %2092 = vst [vmem:[%s3320_s23 + $0x38] sm:$0xff] %v2082_v35  ;;  %v2101_v42 = vadd.f32 %v2100_v7, %v2082_v35  ;;  %v2117_v16 = vmul.f32 %v2082_v35, %v2082_v35  ;;  %v1371_v37 = vpop.f32.mrf.mxu2  ;;  %v1229_v17 = vpop.f32.mrf.mxu1 }
 0x188   : > { %v1384_v13 = vadd.f32 %v1371_v37, %v1240_v12  ;;  %v1241_v40 = vadd.f32 %v1229_v17, %v3279_v47  ;;  %v1661_v47 = vpop.f32.mrf.mxu0 }
 0x189   : > { %v2126_v6 = vadd.f32 %v2125_v36, %v2117_v16 }
 0x18a   : > { %v1528_v49 = vadd.f32 %v1515_v27, %v1384_v13 }
 0x18c   : > { %v1672_v22 = vadd.f32 %v1659_v46, %v1528_v49 }
 0x18e   : > { %v2083_v0 = vsel %vm2043_vm9, %v1672_v22, 0.0 }
 0x18f   : > { %2093 = vst [vmem:[%s3320_s23 + $0x40] sm:$0xff] %v2083_v0  ;;  %v2102_v58 = vadd.f32 %v2101_v42, %v2083_v0  ;;  %v2118_v59 = vmul.f32 %v2083_v0, %v2083_v0  ;;  %v1373_v33 = vpop.f32.mrf.mxu2 }
 0x190   : > { %v1385_v50 = vadd.f32 %v1373_v33, %v1241_v40 }
 0x191   : > { %v2127_v8 = vadd.f32 %v2126_v6, %v2118_v59 }
 0x192   : > { %v1529_v45 = vadd.f32 %v1517_v43, %v1385_v50 }
 0x194   : > { %v1673_v60 = vadd.f32 %v1661_v47, %v1529_v45 }
 0x196   : > { %v2084_v1 = vsel %vm2044_vm11, %v1673_v60, 0.0 }
 0x197   : > { %2094 = vst [vmem:[%s3320_s23 + $0x48] sm:$0xff] %v2084_v1  ;;  %v2103_v24 = vadd.f32 %v2102_v58, %v2084_v1  ;;  %v2119_v55 = vmul.f32 %v2084_v1, %v2084_v1 }
 0x198   : > { %2843 = shalt.err (!%p2840_p10)
}
 0x199   : > { %s2927_s25 = smov 128   ;;  %s2928_s18 = smov 8   ;;  %v2104_v23 = vrot.slane %v2103_v24, 4  ;;  %v2128_v61 = vadd.f32 %v2127_v8, %v2119_v55  ;;  %vm2135_vm12 = vcmask 1040384  }
 0x19a   : > { %2692 = dma.vmem_to_hbm [thread:$0]  (%p3016_p7), %s2157_s27, 1280, %s2159_s28, %s2139_s29, %s2927_s25, %s2927_s25, %s2928_s18  }
 0x19b   : > { %v2105_v62 = vadd.f32 %v2104_v23, %v2103_v24  ;;  %v2129_v57 = vrot.slane %v2128_v61, 4  ;;  %s2300_s23 = sshll.u32 %s3044_s10, 1  ;;  %s2591_s17 = sshll.u32 %s2970_s16, 1 }
 0x19c   : > { %s2171_s24 = scalar_lea.hbm %s3528_s3, %s2591_s17  ;;  %s219_s27 = scalar_lea.vmem [#allocation10], %s2300_s23 }
 0x19d   : > { %v2106_v63 = vrot.slane %v2105_v62, 2  ;;  %v2130_v2 = vadd.f32 %v2129_v57, %v2128_v61  ;;  %s2173_s28 = sshll.u32 %s219_s27, 4  ;;  %s2175_s29 = sshll.u32 %s2171_s24, 4  ;;  %s2174_s28 = int_to_ptr.vmem [resolvable:$true] %s2173_s28  ;;  %s2176_s29 = int_to_ptr.hbm [resolvable:$true] %s2175_s29 }
 0x19e   : > { %s2144_s16 = scalar_lea.sflag [#allocation11], %s3044_s10  ;;  %s2858_s30 = sshra.s32 %s2176_s29, 4  ;;  %s2859_s30 = int_to_ptr.hbm [resolvable:$true] %s2858_s30 }
 0x19f   : > { %v2107_v54 = vadd.f32 %v2106_v63, %v2105_v62  ;;  %v2131_v48 = vrot.slane %v2130_v2, 2  ;;  %s2860_s7 = scalar_lea.hbm %s2859_s30, 2  ;;  %s2864_s9 = scalar_lea.hbm %s3528_s3, 4 }
 0x1a0   : > { %p2861_p12 = scmp.ne.s32.totalorder %s2859_s30, %s2860_s7  ;;  %p2865_p3 = scmp.lt.s32.totalorder %s2859_s30, %s3528_s3 }
 0x1a1   : > { %v2108_v51 = vrot.slane %v2107_v54, 1  ;;  %v2132_v34 = vadd.f32 %v2131_v48, %v2130_v2  ;;  %p2866_p5 = scmp.lt.s32.totalorder %s2864_s9, %s2860_s7 }
 0x1a2   : > { %p2862_p13 = pnand %p2861_p12, %p3016_p7 }
 0x1a3   : > { %v2133_v4 = vrot.slane %v2132_v34, 1  ;;  %v2109_v10 = vadd.f32 %v2108_v51, %v2107_v54  ;;  %p2867_p1 = por %p2866_p5, %p2865_p3 }
 0x1a4   : > { %p2863_p0 = pneg %p2862_p13 }
 0x1a5   : > { %v2134_v15 = vadd.f32 %v2133_v4, %v2132_v34 }
 0x1a6   : > { %p2868_p4 = pnand %p2867_p1, %p2863_p0 }
 0x1a7   : > { %v2136_v14 = vsel %vm2135_vm12, %v2109_v10, %v2134_v15 }
 0x1a8   : > { %2137 = vst [vmem:[%s219_s27] sm:$0x3] %v2136_v14 }
 0x1a9   : > { %2871 = shalt.err (!%p2868_p4)
}
 0x1aa   : > { %2693 = dma.vmem_to_hbm [thread:$0]  (%p3016_p7), %s2174_s28, 32, %s2176_s29, %s2144_s16  }
 0x1ab PF: > { %s2187_s10 = sand.u32 1, %s2906_s12   ;;  %p3558_p8 = scmp.ge.s32.totalorder %s2918_s15, 2 }
 0x1ac   : > { %s2188_s25 = scalar_lea.sflag [#allocation6], %s2187_s10 }
 0x1ad   : > { %p2705_p11 = pnand %p3558_p8, %p2984_p6 }
 0x1af   : > { %p2706_p9 = pneg %p2705_p11 }
 0x1b1   : > { %2897 = dma.done.wait (%p2706_p9), %s2188_s25, 1280  }
 0x1b2   : > { %2899 = vsyncadd (%p2706_p9), %s2188_s25, 4294966016  ;;  %s2198_s18 = scalar_lea.sflag [#allocation11], %s2187_s10 }
 0x1b3   : > { %2901 = dma.done.wait (%p2706_p9), %s2198_s18, 32  }
 0x1b4   : > { %2903 = vsyncadd (%p2706_p9), %s2198_s18, 4294967264  ;;  %p21_p7 = scmp.ge.s32.totalorder %s3002_s26, 4   ;;  %s3559_s12 = smov %s2910_s13 }
 0x1b5   : > { %s3560_s13 = smov %s2914_s14  ;;  %s3561_s14 = smov %s3012_s4 }
 0x1b6   : > { %s3562_s15 = smov %s3002_s26  ;;  %23 = sbr.rel (!%p21_p7) target bundleno = 8 (0x8), region = 102 }
 0x1bb   :  { %2204 = vsyncpa [#allocation5], 1 }
 0x1bc   :  { %2206 = vsyncpa [#allocation5 + $0x1], 1 }
 0x1bd   :  { %2207 = vsyncpa [#allocation8], 1 }
 0x1be   :  { %2208 = vsyncpa [#allocation6], 1 }
 0x1bf   :  { %2210 = vsyncpa [#allocation6 + $0x1], 1 }
 0x1c0   :  { %2211 = vsyncpa [#allocation11], 1 }
 0x1c1   :  { %2213 = vsyncpa [#allocation11 + $0x1], 1 }

</bundles_post_ra>
